<compile_context>
chip_gen: v6e
topology: v6e:2x2x1
jax: 0.10.0
libtpu: 0.0.40
codegen_flags: <defaults>
</compile_context>

<pallas_src>
import numpy as np
import jax
import jax.numpy as jnp
from jax.experimental import pallas as pl
from jax.experimental.pallas import tpu as pltpu

# ---- model hyperparameters (consistent with the torch module ctor) ----
BATCH        = 2
FEATURE_SIZE = 16     # F
SEQ_LEN      = 8      # S
NUM_CLASSES  = 10     # C
MODEL_DIM    = 128    # D  (ctor default is 256; 128 keeps the example small)
NHEAD        = 4      # H
NUM_LAYERS   = 3      # L
FFN_DIM      = 512    # hardcoded dim_feedforward in the torch module
HEAD_DIM     = MODEL_DIM // NHEAD
LN_EPS       = 1e-5
OUT_PAD      = 128    # lane-dense padded classifier width (sliced to C outside)

BS = BATCH * SEQ_LEN  # flattened activation rows = 16 (one full bf16 sublane group)

# Packed small-vector operands (replace 12 separate tiny input DMAs with 2).
GVEC_ROWS = 16        # rows 0..S-1: pos + bemb, row S: padded classifier bias
LVEC_ROWS = 8         # per-layer pack, FFN_DIM (512) lanes wide
LV_B1, LV_BQKV, LV_BO, LV_LN1G, LV_LN1B, LV_LN2G, LV_LN2B, LV_B2 = range(8)


def _mmb(a, w):
    """Activation @ bf16 weight on the MXU (native bf16 path), f32 accumulation."""
    return jnp.dot(a.astype(w.dtype), w, preferred_element_type=jnp.float32)


def _layernorm(v, g, b):
    mu = jnp.mean(v, axis=-1, keepdims=True)
    var = jnp.mean((v - mu) ** 2, axis=-1, keepdims=True)
    return (v - mu) * jax.lax.rsqrt(var + LN_EPS) * g + b


def transformer_kernel(x_ref, wemb_ref, gvec_ref, wout_ref,
                       wqkv_ref, wo_ref, w1_ref, w2_ref, lvec_ref,
                       out_ref, h_ref):
    B, S, D, H, Dh = BATCH, SEQ_LEN, MODEL_DIM, NHEAD, HEAD_DIM
    l = pl.program_id(0)

    # ---- first grid step only: fold the torch permute + embedding + pos ----
    @pl.when(l == 0)
    def _embed():
        x = x_ref[...]                                            # (B, F, S) f32
        xt = jnp.concatenate([jnp.transpose(x[b]) for b in range(B)], axis=0)  # (BS, F)
        emb = _mmb(xt, wemb_ref[...])                             # (BS, D) f32
        posb = gvec_ref[0:S, :]                                   # (S, D) = pos + bemb
        h_ref[...] = emb + jnp.concatenate([posb] * B, axis=0)

    # ---- per-layer small vectors (one packed f32 operand per layer) ----
    lv = lvec_ref[...]                                            # (8, 512) f32
    b1   = lv[LV_B1:LV_B1 + 1, :]                                 # (1, FF)
    bqkv = lv[LV_BQKV:LV_BQKV + 1, 0:3 * D]                       # (1, 3D) (Q part pre-scaled)
    bo   = lv[LV_BO:LV_BO + 1, 0:D]
    ln1g = lv[LV_LN1G:LV_LN1G + 1, 0:D]
    ln1b = lv[LV_LN1B:LV_LN1B + 1, 0:D]
    ln2g = lv[LV_LN2G:LV_LN2G + 1, 0:D]
    ln2b = lv[LV_LN2B:LV_LN2B + 1, 0:D]
    b2   = lv[LV_B2:LV_B2 + 1, 0:D]

    h = h_ref[...]                                                # (BS, D) f32

    # ---- multi-head self-attention (post-LN encoder layer) ----
    # 1/sqrt(Dh) is already folded into the Q columns of wqkv / bqkv.
    qkv = _mmb(h, wqkv_ref[...]) + bqkv                           # (BS, 3D) f32
    q, k, v = qkv[:, 0:D], qkv[:, D:2 * D], qkv[:, 2 * D:3 * D]

    def split_heads(t):   # (BS, D) -> (H*B, S, Dh) bf16, head-major batch
        return jnp.concatenate(
            [t[:, hh * Dh:(hh + 1) * Dh].reshape(B, S, Dh) for hh in range(H)],
            axis=0).astype(jnp.bfloat16)

    qh, kh, vh = split_heads(q), split_heads(k), split_heads(v)   # (H*B, S, Dh)

    s = jnp.einsum('bqd,bkd->bqk', qh, kh,
                   preferred_element_type=jnp.float32)            # (H*B, S, S)
    s = s - jnp.max(s, axis=-1, keepdims=True)
    p = jnp.exp(s)
    p = p * pl.reciprocal(jnp.sum(p, axis=-1, keepdims=True), approx=True)  # EUP slot
    o = jnp.einsum('bqk,bkd->bqd', p.astype(jnp.bfloat16), vh,
                   preferred_element_type=jnp.float32)            # (H*B, S, Dh)
    o = jnp.concatenate(
        [o[hh * B:(hh + 1) * B].reshape(B * S, Dh) for hh in range(H)], axis=-1)

    attn = _mmb(o, wo_ref[...]) + bo                              # (BS, D)
    h = _layernorm(h + attn, ln1g, ln1b)

    # ---- feed-forward (relu) ----
    f = jnp.maximum(_mmb(h, w1_ref[...]) + b1, 0.0)               # (BS, FF)
    f = _mmb(f, w2_ref[...]) + b2                                 # (BS, D)
    h = _layernorm(h + f, ln2g, ln2b)
    h_ref[...] = h

    # ---- last grid step: mean pool over seq + lane-dense classifier ----
    @pl.when(l == pl.num_programs(0) - 1)
    def _head():
        pooled = jnp.mean(h.reshape(B, S, D), axis=1)             # (B, D)
        bout = gvec_ref[S:S + 1, :]                               # (1, OUT_PAD)
        out_ref[...] = _mmb(pooled, wout_ref[...]) + bout         # (B, OUT_PAD)


@jax.jit
def forward(x, params):
    """x: (batch, feature_size, seq_length) float32 — exactly the torch layout.

    params must come from prepare_params().  The permute happens inside the
    kernel; the only wrapper-side op is the final slice to num_classes.
    """
    D, FF = MODEL_DIM, FFN_DIM
    out_p = pl.pallas_call(
        transformer_kernel,
        out_shape=jax.ShapeDtypeStruct((BATCH, OUT_PAD), jnp.float32),
        grid=(NUM_LAYERS,),
        in_specs=[
            # resident operands (constant block index -> DMA'd once, kept in VMEM)
            pl.BlockSpec((BATCH, FEATURE_SIZE, SEQ_LEN), lambda l: (0, 0, 0)),  # x
            pl.BlockSpec((FEATURE_SIZE, D), lambda l: (0, 0)),                  # wemb
            pl.BlockSpec((GVEC_ROWS, D), lambda l: (0, 0)),                     # gvec
            pl.BlockSpec((D, OUT_PAD), lambda l: (0, 0)),                       # wout
            # per-layer operands, streamed (double-buffered) along the grid axis
            pl.BlockSpec((None, D, 3 * D), lambda l: (l, 0, 0)),                # wqkv
            pl.BlockSpec((None, D, D), lambda l: (l, 0, 0)),                    # wo
            pl.BlockSpec((None, D, FF), lambda l: (l, 0, 0)),                   # w1
            pl.BlockSpec((None, FF, D), lambda l: (l, 0, 0)),                   # w2
            pl.BlockSpec((None, LVEC_ROWS, FF), lambda l: (l, 0, 0)),           # lvec
        ],
        out_specs=pl.BlockSpec((BATCH, OUT_PAD), lambda l: (0, 0)),
        scratch_shapes=[pltpu.VMEM((BS, MODEL_DIM), jnp.float32)],  # residual stream
        compiler_params=pltpu.CompilerParams(
            # The layer axis carries the residual stream -> sequential.
            # TODO(synk): at production batch sizes add a leading "parallel"
            # grid axis over batch/row tiles so both v7x TensorCores are used.
            dimension_semantics=("arbitrary",),
            vmem_limit_bytes=16 << 20),
    )(x, params["wemb"], params["gvec"], params["wout"],
      params["wqkv"], params["wo"], params["w1"], params["w2"], params["lvec"])
    return out_p[:, :NUM_CLASSES]                                 # (B, C)


def prepare_params(p):
    """Repack raw parameters for the kernel:
      * weight matrices -> bf16 (halves dominant HBM weight traffic, native MXU),
      * 1/sqrt(head_dim) folded into the Q columns of wqkv / bqkv,
      * pos+bemb and the classifier bias packed into one global f32 operand,
      * the 8 per-layer bias / LN vectors packed into one (L, 8, 512) f32 operand,
      * classifier weight zero-padded to a lane-dense 128-wide output.
    """
    D, S, C, L, FF = MODEL_DIM, SEQ_LEN, NUM_CLASSES, NUM_LAYERS, FFN_DIM
    scale = 1.0 / float(np.sqrt(HEAD_DIM))

    wqkv = p["wqkv"].at[:, :, :D].multiply(scale)
    bqkv = p["bqkv"].at[:, :, :D].multiply(scale)

    gvec = jnp.zeros((GVEC_ROWS, D), jnp.float32)
    gvec = gvec.at[:S, :].set(p["pos"] + p["bemb"])
    gvec = gvec.at[S, :C].set(p["bout"][0])

    lvec = jnp.zeros((L, LVEC_ROWS, FF), jnp.float32)
    lvec = lvec.at[:, LV_B1, :].set(p["b1"][:, 0, :])
    lvec = lvec.at[:, LV_BQKV, :3 * D].set(bqkv[:, 0, :])
    lvec = lvec.at[:, LV_BO, :D].set(p["bo"][:, 0, :])
    lvec = lvec.at[:, LV_LN1G, :D].set(p["ln1g"][:, 0, :])
    lvec = lvec.at[:, LV_LN1B, :D].set(p["ln1b"][:, 0, :])
    lvec = lvec.at[:, LV_LN2G, :D].set(p["ln2g"][:, 0, :])
    lvec = lvec.at[:, LV_LN2B, :D].set(p["ln2b"][:, 0, :])
    lvec = lvec.at[:, LV_B2, :D].set(p["b2"][:, 0, :])

    wout = jnp.zeros((D, OUT_PAD), jnp.float32).at[:, :C].set(p["wout"])

    return dict(
        wemb=p["wemb"].astype(jnp.bfloat16),
        gvec=gvec,
        wout=wout.astype(jnp.bfloat16),
        wqkv=wqkv.astype(jnp.bfloat16),
        wo=p["wo"].astype(jnp.bfloat16),
        w1=p["w1"].astype(jnp.bfloat16),
        w2=p["w2"].astype(jnp.bfloat16),
        lvec=lvec,
    )


def init_params(key):
    F, S, D, C, L, FF = FEATURE_SIZE, SEQ_LEN, MODEL_DIM, NUM_CLASSES, NUM_LAYERS, FFN_DIM
    ks = jax.random.split(key, 16)
    sc = 0.1

    def rnd(k, shape):
        return (sc * jax.random.normal(k, shape)).astype(jnp.float32)

    return dict(
        wemb=rnd(ks[0], (F, D)),        bemb=rnd(ks[1], (1, D)),
        pos=rnd(ks[2], (S, D)),
        wqkv=rnd(ks[3], (L, D, 3 * D)), bqkv=rnd(ks[4], (L, 1, 3 * D)),
        wo=rnd(ks[5], (L, D, D)),       bo=rnd(ks[6], (L, 1, D)),
        ln1g=jnp.ones((L, 1, D), jnp.float32), ln1b=jnp.zeros((L, 1, D), jnp.float32),
        ln2g=jnp.ones((L, 1, D), jnp.float32), ln2b=jnp.zeros((L, 1, D), jnp.float32),
        w1=rnd(ks[7], (L, D, FF)),      b1=rnd(ks[8], (L, 1, FF)),
        w2=rnd(ks[9], (L, FF, D)),      b2=rnd(ks[10], (L, 1, D)),
        wout=rnd(ks[11], (D, C)),       bout=rnd(ks[12], (1, C)),
    )


def reference(x, p):
    """Pure-JAX f32 reference with identical math (sanity check)."""
    xt = jnp.transpose(x, (0, 2, 1))
    h = xt @ p["wemb"] + p["bemb"] + p["pos"]

    def ln(v, g, b):
        mu = v.mean(-1, keepdims=True)
        var = ((v - mu) ** 2).mean(-1, keepdims=True)
        return (v - mu) / jnp.sqrt(var + LN_EPS) * g + b

    B, S, D = h.shape
    for l in range(NUM_LAYERS):
        qkv = h @ p["wqkv"][l] + p["bqkv"][l]
        q, k, v = jnp.split(qkv, 3, axis=-1)

        def heads(t):
            return t.reshape(B, S, NHEAD, HEAD_DIM).transpose(0, 2, 1, 3)

        qh, kh, vh = heads(q), heads(k), heads(v)
        s = jnp.einsum('bhqd,bhkd->bhqk', qh, kh) / np.sqrt(HEAD_DIM)
        pa = jax.nn.softmax(s, axis=-1)
        o = jnp.einsum('bhqk,bhkd->bhqd', pa, vh).transpose(0, 2, 1, 3).reshape(B, S, D)
        attn = o @ p["wo"][l] + p["bo"][l]
        h = ln(h + attn, p["ln1g"][l], p["ln1b"][l])
        f = jax.nn.relu(h @ p["w1"][l] + p["b1"][l]) @ p["w2"][l] + p["b2"][l]
        h = ln(h + f, p["ln2g"][l], p["ln2b"][l])
    return h.mean(1) @ p["wout"] + p["bout"]


if __name__ == "__main__":
    key = jax.random.PRNGKey(0)
    kx, kp = jax.random.split(key)
    # Input matches the torch module: (batch, feature_size, seq_length)
    x = jax.random.normal(kx, (BATCH, FEATURE_SIZE, SEQ_LEN), jnp.float32)
    params = init_params(kp)
    kernel_params = prepare_params(params)

    out = jax.block_until_ready(forward(x, kernel_params))
    ref = jax.block_until_ready(reference(x, params))

    assert out.shape == (BATCH, NUM_CLASSES)
    assert np.all(np.isfinite(np.asarray(out)))
    # Tolerance absorbs bf16 weight/activation quantization (incl. bf16 attention
    # matmuls) and the approximate EUP reciprocal in the softmax.
    np.testing.assert_allclose(np.asarray(out), np.asarray(ref),
                               rtol=5e-2, atol=3e-2)

    print("KERNEL_OK")
</pallas_src>

<mosaic_0001>
module attributes {stable_mosaic.version = 11 : i64} {
  func.func @transformer_kernel(%arg0: i32, %arg1: memref<2x16x8xf32, #tpu.memory_space<vmem>>, %arg2: memref<16x128xbf16, #tpu.memory_space<vmem>>, %arg3: memref<16x128xf32, #tpu.memory_space<vmem>>, %arg4: memref<128x128xbf16, #tpu.memory_space<vmem>>, %arg5: memref<1x128x384xbf16, #tpu.memory_space<vmem>>, %arg6: memref<1x128x128xbf16, #tpu.memory_space<vmem>>, %arg7: memref<1x128x512xbf16, #tpu.memory_space<vmem>>, %arg8: memref<1x512x128xbf16, #tpu.memory_space<vmem>>, %arg9: memref<1x8x512xf32, #tpu.memory_space<vmem>>, %arg10: memref<2x128xf32, #tpu.memory_space<vmem>>, %arg11: memref<16x128xf32, #tpu.memory_space<vmem>>) attributes {dimension_semantics = [#tpu.dimension_semantics<arbitrary>], iteration_bounds = array<i64: 3>, scalar_prefetch = 0 : i64, scratch_operands = 1 : i64, tpu.core_type = #tpu.core_type<tc>, window_params = [{pipeline_mode = #tpu.pipeline_mode<synchronous>, transform_indices = @transform_0, window_bounds = array<i64: 2, 16, 8>}, {pipeline_mode = #tpu.pipeline_mode<synchronous>, transform_indices = @transform_1, window_bounds = array<i64: 16, 128>}, {pipeline_mode = #tpu.pipeline_mode<synchronous>, transform_indices = @transform_2, window_bounds = array<i64: 16, 128>}, {pipeline_mode = #tpu.pipeline_mode<synchronous>, transform_indices = @transform_3, window_bounds = array<i64: 128, 128>}, {transform_indices = @transform_4, window_bounds = array<i64: 1, 128, 384>}, {transform_indices = @transform_5, window_bounds = array<i64: 1, 128, 128>}, {transform_indices = @transform_6, window_bounds = array<i64: 1, 128, 512>}, {transform_indices = @transform_7, window_bounds = array<i64: 1, 512, 128>}, {transform_indices = @transform_8, window_bounds = array<i64: 1, 8, 512>}, {pipeline_mode = #tpu.pipeline_mode<synchronous>, transform_indices = @transform_9, window_bounds = array<i64: 2, 128>}]} {
    %c0_i32 = arith.constant 0 : i32
    %0 = arith.cmpi eq, %arg0, %c0_i32 : i32
    %1 = arith.extui %0 : i1 to i32
    %c0_i32_0 = arith.constant 0 : i32
    %2 = arith.cmpi ne, %1, %c0_i32_0 : i32
    scf.if %2 {
      %c0_38 = arith.constant 0 : index
      %c0_39 = arith.constant 0 : index
      %c0_40 = arith.constant 0 : index
      %145 = vector.load %arg1[%c0_38, %c0_39, %c0_40] : memref<2x16x8xf32, #tpu.memory_space<vmem>>, vector<2x16x8xf32>
      %146 = vector.extract_strided_slice %145 {offsets = [0, 0, 0], sizes = [1, 16, 8], strides = [1, 1, 1]} : vector<2x16x8xf32> to vector<1x16x8xf32>
      %147 = vector.shape_cast %146 : vector<1x16x8xf32> to vector<16x8xf32>
      %148 = tpu.transpose %147, [1, 0] : vector<16x8xf32> -> vector<8x16xf32>
      %149 = vector.extract_strided_slice %145 {offsets = [1, 0, 0], sizes = [1, 16, 8], strides = [1, 1, 1]} : vector<2x16x8xf32> to vector<1x16x8xf32>
      %150 = vector.shape_cast %149 : vector<1x16x8xf32> to vector<16x8xf32>
      %151 = tpu.transpose %150, [1, 0] : vector<16x8xf32> -> vector<8x16xf32>
      %152 = tpu.concatenate %148, %151 in 0 : vector<8x16xf32>, vector<8x16xf32> -> vector<16x16xf32>
      %c0_41 = arith.constant 0 : index
      %c0_42 = arith.constant 0 : index
      %153 = vector.load %arg2[%c0_41, %c0_42] : memref<16x128xbf16, #tpu.memory_space<vmem>>, vector<16x128xbf16>
      %154 = arith.truncf %152 : vector<16x16xf32> to vector<16x16xbf16>
      %cst_43 = arith.constant dense<0.000000e+00> : vector<16x128xf32>
      %155 = tpu.matmul %154, %153, %cst_43 {dimension_numbers = #tpu.dot_dimension_numbers<[1], [0], [0], [1], [0, 0, 1, 1], [], []>} : vector<16x16xbf16>, vector<16x128xbf16>, vector<16x128xf32> -> vector<16x128xf32>
      %c0_44 = arith.constant 0 : index
      %c0_45 = arith.constant 0 : index
      %156 = vector.load %arg3[%c0_44, %c0_45] : memref<16x128xf32, #tpu.memory_space<vmem>>, vector<8x128xf32>
      %157 = tpu.concatenate %156, %156 in 0 : vector<8x128xf32>, vector<8x128xf32> -> vector<16x128xf32>
      %158 = arith.addf %155, %157 : vector<16x128xf32>
      %c0_46 = arith.constant 0 : index
      %c0_47 = arith.constant 0 : index
      %159 = vector.load %arg11[%c0_46, %c0_47] : memref<16x128xf32, #tpu.memory_space<vmem>>, vector<16x128xf32>
      tpu.vector_store %arg11[%c0_46, %c0_47], %158 {strides = array<i32>} : memref<16x128xf32, #tpu.memory_space<vmem>>, vector<16x128xf32>,
    } else {
    }
    %c0 = arith.constant 0 : index
    %c0_1 = arith.constant 0 : index
    %c0_2 = arith.constant 0 : index
    %3 = vector.load %arg9[%c0, %c0_1, %c0_2] : memref<1x8x512xf32, #tpu.memory_space<vmem>>, vector<1x8x512xf32>
    %4 = vector.shape_cast %3 : vector<1x8x512xf32> to vector<8x512xf32>
    %5 = vector.extract_strided_slice %4 {offsets = [0, 0], sizes = [1, 512], strides = [1, 1]} : vector<8x512xf32> to vector<1x512xf32>
    %6 = vector.extract_strided_slice %4 {offsets = [1, 0], sizes = [1, 384], strides = [1, 1]} : vector<8x512xf32> to vector<1x384xf32>
    %7 = vector.extract_strided_slice %4 {offsets = [2, 0], sizes = [1, 128], strides = [1, 1]} : vector<8x512xf32> to vector<1x128xf32>
    %8 = vector.extract_strided_slice %4 {offsets = [3, 0], sizes = [1, 128], strides = [1, 1]} : vector<8x512xf32> to vector<1x128xf32>
    %9 = vector.extract_strided_slice %4 {offsets = [4, 0], sizes = [1, 128], strides = [1, 1]} : vector<8x512xf32> to vector<1x128xf32>
    %10 = vector.extract_strided_slice %4 {offsets = [5, 0], sizes = [1, 128], strides = [1, 1]} : vector<8x512xf32> to vector<1x128xf32>
    %11 = vector.extract_strided_slice %4 {offsets = [6, 0], sizes = [1, 128], strides = [1, 1]} : vector<8x512xf32> to vector<1x128xf32>
    %12 = vector.extract_strided_slice %4 {offsets = [7, 0], sizes = [1, 128], strides = [1, 1]} : vector<8x512xf32> to vector<1x128xf32>
    %c0_3 = arith.constant 0 : index
    %c0_4 = arith.constant 0 : index
    %13 = vector.load %arg11[%c0_3, %c0_4] : memref<16x128xf32, #tpu.memory_space<vmem>>, vector<16x128xf32>
    %c0_5 = arith.constant 0 : index
    %c0_6 = arith.constant 0 : index
    %c0_7 = arith.constant 0 : index
    %14 = vector.load %arg5[%c0_5, %c0_6, %c0_7] : memref<1x128x384xbf16, #tpu.memory_space<vmem>>, vector<1x128x384xbf16>
    %15 = vector.shape_cast %14 : vector<1x128x384xbf16> to vector<128x384xbf16>
    %16 = arith.truncf %13 : vector<16x128xf32> to vector<16x128xbf16>
    %cst = arith.constant dense<0.000000e+00> : vector<16x384xf32>
    %17 = tpu.matmul %16, %15, %cst {dimension_numbers = #tpu.dot_dimension_numbers<[1], [0], [0], [1], [0, 0, 1, 1], [], []>} : vector<16x128xbf16>, vector<128x384xbf16>, vector<16x384xf32> -> vector<16x384xf32>
    %18 = vector.broadcast %6 : vector<1x384xf32> to vector<16x384xf32>
    %19 = arith.addf %17, %18 : vector<16x384xf32>
    %20 = vector.extract_strided_slice %19 {offsets = [0, 0], sizes = [16, 128], strides = [1, 1]} : vector<16x384xf32> to vector<16x128xf32>
    %21 = vector.extract_strided_slice %19 {offsets = [0, 128], sizes = [16, 128], strides = [1, 1]} : vector<16x384xf32> to vector<16x128xf32>
    %22 = vector.extract_strided_slice %19 {offsets = [0, 256], sizes = [16, 128], strides = [1, 1]} : vector<16x384xf32> to vector<16x128xf32>
    %23 = vector.extract_strided_slice %20 {offsets = [0, 0], sizes = [16, 32], strides = [1, 1]} : vector<16x128xf32> to vector<16x32xf32>
    %24 = vector.shape_cast %23 : vector<16x32xf32> to vector<2x8x32xf32>
    %25 = vector.extract_strided_slice %20 {offsets = [0, 32], sizes = [16, 32], strides = [1, 1]} : vector<16x128xf32> to vector<16x32xf32>
    %26 = vector.shape_cast %25 : vector<16x32xf32> to vector<2x8x32xf32>
    %27 = vector.extract_strided_slice %20 {offsets = [0, 64], sizes = [16, 32], strides = [1, 1]} : vector<16x128xf32> to vector<16x32xf32>
    %28 = vector.shape_cast %27 : vector<16x32xf32> to vector<2x8x32xf32>
    %29 = vector.extract_strided_slice %20 {offsets = [0, 96], sizes = [16, 32], strides = [1, 1]} : vector<16x128xf32> to vector<16x32xf32>
    %30 = vector.shape_cast %29 : vector<16x32xf32> to vector<2x8x32xf32>
    %31 = tpu.concatenate %24, %26, %28, %30 in 0 : vector<2x8x32xf32>, vector<2x8x32xf32>, vector<2x8x32xf32>, vector<2x8x32xf32> -> vector<8x8x32xf32>
    %32 = arith.truncf %31 : vector<8x8x32xf32> to vector<8x8x32xbf16>
    %33 = vector.extract_strided_slice %21 {offsets = [0, 0], sizes = [16, 32], strides = [1, 1]} : vector<16x128xf32> to vector<16x32xf32>
    %34 = vector.shape_cast %33 : vector<16x32xf32> to vector<2x8x32xf32>
    %35 = vector.extract_strided_slice %21 {offsets = [0, 32], sizes = [16, 32], strides = [1, 1]} : vector<16x128xf32> to vector<16x32xf32>
    %36 = vector.shape_cast %35 : vector<16x32xf32> to vector<2x8x32xf32>
    %37 = vector.extract_strided_slice %21 {offsets = [0, 64], sizes = [16, 32], strides = [1, 1]} : vector<16x128xf32> to vector<16x32xf32>
    %38 = vector.shape_cast %37 : vector<16x32xf32> to vector<2x8x32xf32>
    %39 = vector.extract_strided_slice %21 {offsets = [0, 96], sizes = [16, 32], strides = [1, 1]} : vector<16x128xf32> to vector<16x32xf32>
    %40 = vector.shape_cast %39 : vector<16x32xf32> to vector<2x8x32xf32>
    %41 = tpu.concatenate %34, %36, %38, %40 in 0 : vector<2x8x32xf32>, vector<2x8x32xf32>, vector<2x8x32xf32>, vector<2x8x32xf32> -> vector<8x8x32xf32>
    %42 = arith.truncf %41 : vector<8x8x32xf32> to vector<8x8x32xbf16>
    %43 = vector.extract_strided_slice %22 {offsets = [0, 0], sizes = [16, 32], strides = [1, 1]} : vector<16x128xf32> to vector<16x32xf32>
    %44 = vector.shape_cast %43 : vector<16x32xf32> to vector<2x8x32xf32>
    %45 = vector.extract_strided_slice %22 {offsets = [0, 32], sizes = [16, 32], strides = [1, 1]} : vector<16x128xf32> to vector<16x32xf32>
    %46 = vector.shape_cast %45 : vector<16x32xf32> to vector<2x8x32xf32>
    %47 = vector.extract_strided_slice %22 {offsets = [0, 64], sizes = [16, 32], strides = [1, 1]} : vector<16x128xf32> to vector<16x32xf32>
    %48 = vector.shape_cast %47 : vector<16x32xf32> to vector<2x8x32xf32>
    %49 = vector.extract_strided_slice %22 {offsets = [0, 96], sizes = [16, 32], strides = [1, 1]} : vector<16x128xf32> to vector<16x32xf32>
    %50 = vector.shape_cast %49 : vector<16x32xf32> to vector<2x8x32xf32>
    %51 = tpu.concatenate %44, %46, %48, %50 in 0 : vector<2x8x32xf32>, vector<2x8x32xf32>, vector<2x8x32xf32>, vector<2x8x32xf32> -> vector<8x8x32xf32>
    %52 = arith.truncf %51 : vector<8x8x32xf32> to vector<8x8x32xbf16>
    "tpu.trace_start"() <{level = 10 : i32, message = "bqd,bkd->bqk"}> : () -> ()
    %cst_8 = arith.constant dense<0.000000e+00> : vector<8x8x8xf32>
    %53 = tpu.matmul %32, %42, %cst_8 {dimension_numbers = #tpu.dot_dimension_numbers<[2], [2], [1], [1], [0, 0, 0, 1, 1, 1], [0], [0]>} : vector<8x8x32xbf16>, vector<8x8x32xbf16>, vector<8x8x8xf32> -> vector<8x8x8xf32>
    "tpu.trace_stop"() : () -> ()
    %cst_9 = arith.constant dense<0xFF800000> : vector<8x8xf32>
    %54 = vector.multi_reduction <maximumf>, %53, %cst_9 [2] : vector<8x8x8xf32> to vector<8x8xf32>
    %55 = vector.shape_cast %54 : vector<8x8xf32> to vector<8x8x1xf32>
    %56 = vector.broadcast %55 : vector<8x8x1xf32> to vector<8x8x8xf32>
    %57 = arith.subf %53, %56 : vector<8x8x8xf32>
    %58 = math.exp %57 : vector<8x8x8xf32>
    %cst_10 = arith.constant dense<0.000000e+00> : vector<8x8xf32>
    %59 = vector.multi_reduction <add>, %58, %cst_10 [2] : vector<8x8x8xf32> to vector<8x8xf32>
    %60 = vector.shape_cast %59 : vector<8x8xf32> to vector<8x8x1xf32>
    %61 = tpu.reciprocal %60 {approx = true} : vector<8x8x1xf32> -> vector<8x8x1xf32>
    %62 = vector.broadcast %61 : vector<8x8x1xf32> to vector<8x8x8xf32>
    %63 = arith.mulf %58, %62 : vector<8x8x8xf32>
    %64 = arith.truncf %63 : vector<8x8x8xf32> to vector<8x8x8xbf16>
    "tpu.trace_start"() <{level = 10 : i32, message = "bqk,bkd->bqd"}> : () -> ()
    %cst_11 = arith.constant dense<0.000000e+00> : vector<8x8x32xf32>
    %65 = tpu.matmul %64, %52, %cst_11 {dimension_numbers = #tpu.dot_dimension_numbers<[2], [1], [1], [2], [0, 0, 0, 1, 1, 2], [0], [0]>} : vector<8x8x8xbf16>, vector<8x8x32xbf16>, vector<8x8x32xf32> -> vector<8x8x32xf32>
    "tpu.trace_stop"() : () -> ()
    %66 = vector.extract_strided_slice %65 {offsets = [0, 0, 0], sizes = [2, 8, 32], strides = [1, 1, 1]} : vector<8x8x32xf32> to vector<2x8x32xf32>
    %67 = vector.shape_cast %66 : vector<2x8x32xf32> to vector<16x32xf32>
    %68 = vector.extract_strided_slice %65 {offsets = [2, 0, 0], sizes = [2, 8, 32], strides = [1, 1, 1]} : vector<8x8x32xf32> to vector<2x8x32xf32>
    %69 = vector.shape_cast %68 : vector<2x8x32xf32> to vector<16x32xf32>
    %70 = vector.extract_strided_slice %65 {offsets = [4, 0, 0], sizes = [2, 8, 32], strides = [1, 1, 1]} : vector<8x8x32xf32> to vector<2x8x32xf32>
    %71 = vector.shape_cast %70 : vector<2x8x32xf32> to vector<16x32xf32>
    %72 = vector.extract_strided_slice %65 {offsets = [6, 0, 0], sizes = [2, 8, 32], strides = [1, 1, 1]} : vector<8x8x32xf32> to vector<2x8x32xf32>
    %73 = vector.shape_cast %72 : vector<2x8x32xf32> to vector<16x32xf32>
    %74 = tpu.concatenate %67, %69, %71, %73 in 1 : vector<16x32xf32>, vector<16x32xf32>, vector<16x32xf32>, vector<16x32xf32> -> vector<16x128xf32>
    %c0_12 = arith.constant 0 : index
    %c0_13 = arith.constant 0 : index
    %c0_14 = arith.constant 0 : index
    %75 = vector.load %arg6[%c0_12, %c0_13, %c0_14] : memref<1x128x128xbf16, #tpu.memory_space<vmem>>, vector<1x128x128xbf16>
    %76 = vector.shape_cast %75 : vector<1x128x128xbf16> to vector<128x128xbf16>
    %77 = arith.truncf %74 : vector<16x128xf32> to vector<16x128xbf16>
    %cst_15 = arith.constant dense<0.000000e+00> : vector<16x128xf32>
    %78 = tpu.matmul %77, %76, %cst_15 {dimension_numbers = #tpu.dot_dimension_numbers<[1], [0], [0], [1], [0, 0, 1, 1], [], []>} : vector<16x128xbf16>, vector<128x128xbf16>, vector<16x128xf32> -> vector<16x128xf32>
    %79 = vector.broadcast %7 : vector<1x128xf32> to vector<16x128xf32>
    %80 = arith.addf %78, %79 : vector<16x128xf32>
    %81 = arith.addf %13, %80 : vector<16x128xf32>
    %cst_16 = arith.constant dense<0.000000e+00> : vector<16xf32>
    %82 = vector.multi_reduction <add>, %81, %cst_16 [1] : vector<16x128xf32> to vector<16xf32>
    %83 = vector.shape_cast %82 : vector<16xf32> to vector<16x1xf32>
    %cst_17 = arith.constant 1.280000e+02 : f32
    %84 = vector.broadcast %cst_17 : f32 to vector<16x1xf32>
    %85 = arith.divf %83, %84 : vector<16x1xf32>
    %86 = vector.broadcast %85 : vector<16x1xf32> to vector<16x128xf32>
    %87 = arith.subf %81, %86 : vector<16x128xf32>
    %88 = arith.mulf %87, %87 : vector<16x128xf32>
    %cst_18 = arith.constant dense<0.000000e+00> : vector<16xf32>
    %89 = vector.multi_reduction <add>, %88, %cst_18 [1] : vector<16x128xf32> to vector<16xf32>
    %90 = vector.shape_cast %89 : vector<16xf32> to vector<16x1xf32>
    %cst_19 = arith.constant 1.280000e+02 : f32
    %91 = vector.broadcast %cst_19 : f32 to vector<16x1xf32>
    %92 = arith.divf %90, %91 : vector<16x1xf32>
    %93 = vector.broadcast %85 : vector<16x1xf32> to vector<16x128xf32>
    %94 = arith.subf %81, %93 : vector<16x128xf32>
    %cst_20 = arith.constant 9.99999974E-6 : f32
    %95 = vector.broadcast %cst_20 : f32 to vector<16x1xf32>
    %96 = arith.addf %92, %95 : vector<16x1xf32>
    %97 = math.rsqrt %96 : vector<16x1xf32>
    %98 = vector.broadcast %97 : vector<16x1xf32> to vector<16x128xf32>
    %99 = arith.mulf %94, %98 : vector<16x128xf32>
    %100 = vector.broadcast %8 : vector<1x128xf32> to vector<16x128xf32>
    %101 = arith.mulf %99, %100 : vector<16x128xf32>
    %102 = vector.broadcast %9 : vector<1x128xf32> to vector<16x128xf32>
    %103 = arith.addf %101, %102 : vector<16x128xf32>
    %c0_21 = arith.constant 0 : index
    %c0_22 = arith.constant 0 : index
    %c0_23 = arith.constant 0 : index
    %104 = vector.load %arg7[%c0_21, %c0_22, %c0_23] : memref<1x128x512xbf16, #tpu.memory_space<vmem>>, vector<1x128x512xbf16>
    %105 = vector.shape_cast %104 : vector<1x128x512xbf16> to vector<128x512xbf16>
    %106 = arith.truncf %103 : vector<16x128xf32> to vector<16x128xbf16>
    %cst_24 = arith.constant dense<0.000000e+00> : vector<16x512xf32>
    %107 = tpu.matmul %106, %105, %cst_24 {dimension_numbers = #tpu.dot_dimension_numbers<[1], [0], [0], [1], [0, 0, 1, 1], [], []>} : vector<16x128xbf16>, vector<128x512xbf16>, vector<16x512xf32> -> vector<16x512xf32>
    %108 = vector.broadcast %5 : vector<1x512xf32> to vector<16x512xf32>
    %109 = arith.addf %107, %108 : vector<16x512xf32>
    %cst_25 = arith.constant 0.000000e+00 : f32
    %110 = vector.broadcast %cst_25 : f32 to vector<16x512xf32>
    %111 = arith.maximumf %109, %110 : vector<16x512xf32>
    %c0_26 = arith.constant 0 : index
    %c0_27 = arith.constant 0 : index
    %c0_28 = arith.constant 0 : index
    %112 = vector.load %arg8[%c0_26, %c0_27, %c0_28] : memref<1x512x128xbf16, #tpu.memory_space<vmem>>, vector<1x512x128xbf16>
    %113 = vector.shape_cast %112 : vector<1x512x128xbf16> to vector<512x128xbf16>
    %114 = arith.truncf %111 : vector<16x512xf32> to vector<16x512xbf16>
    %cst_29 = arith.constant dense<0.000000e+00> : vector<16x128xf32>
    %115 = tpu.matmul %114, %113, %cst_29 {dimension_numbers = #tpu.dot_dimension_numbers<[1], [0], [0], [1], [0, 0, 1, 1], [], []>} : vector<16x512xbf16>, vector<512x128xbf16>, vector<16x128xf32> -> vector<16x128xf32>
    %116 = vector.broadcast %12 : vector<1x128xf32> to vector<16x128xf32>
    %117 = arith.addf %115, %116 : vector<16x128xf32>
    %118 = arith.addf %103, %117 : vector<16x128xf32>
    %cst_30 = arith.constant dense<0.000000e+00> : vector<16xf32>
    %119 = vector.multi_reduction <add>, %118, %cst_30 [1] : vector<16x128xf32> to vector<16xf32>
    %120 = vector.shape_cast %119 : vector<16xf32> to vector<16x1xf32>
    %cst_31 = arith.constant 1.280000e+02 : f32
    %121 = vector.broadcast %cst_31 : f32 to vector<16x1xf32>
    %122 = arith.divf %120, %121 : vector<16x1xf32>
    %123 = vector.broadcast %122 : vector<16x1xf32> to vector<16x128xf32>
    %124 = arith.subf %118, %123 : vector<16x128xf32>
    %125 = arith.mulf %124, %124 : vector<16x128xf32>
    %cst_32 = arith.constant dense<0.000000e+00> : vector<16xf32>
    %126 = vector.multi_reduction <add>, %125, %cst_32 [1] : vector<16x128xf32> to vector<16xf32>
    %127 = vector.shape_cast %126 : vector<16xf32> to vector<16x1xf32>
    %cst_33 = arith.constant 1.280000e+02 : f32
    %128 = vector.broadcast %cst_33 : f32 to vector<16x1xf32>
    %129 = arith.divf %127, %128 : vector<16x1xf32>
    %130 = vector.broadcast %122 : vector<16x1xf32> to vector<16x128xf32>
    %131 = arith.subf %118, %130 : vector<16x128xf32>
    %cst_34 = arith.constant 9.99999974E-6 : f32
    %132 = vector.broadcast %cst_34 : f32 to vector<16x1xf32>
    %133 = arith.addf %129, %132 : vector<16x1xf32>
    %134 = math.rsqrt %133 : vector<16x1xf32>
    %135 = vector.broadcast %134 : vector<16x1xf32> to vector<16x128xf32>
    %136 = arith.mulf %131, %135 : vector<16x128xf32>
    %137 = vector.broadcast %10 : vector<1x128xf32> to vector<16x128xf32>
    %138 = arith.mulf %136, %137 : vector<16x128xf32>
    %139 = vector.broadcast %11 : vector<1x128xf32> to vector<16x128xf32>
    %140 = arith.addf %138, %139 : vector<16x128xf32>
    %c0_35 = arith.constant 0 : index
    %c0_36 = arith.constant 0 : index
    %141 = vector.load %arg11[%c0_35, %c0_36] : memref<16x128xf32, #tpu.memory_space<vmem>>, vector<16x128xf32>
    tpu.vector_store %arg11[%c0_35, %c0_36], %140 {strides = array<i32>} : memref<16x128xf32, #tpu.memory_space<vmem>>, vector<16x128xf32>,
    %c2_i32 = arith.constant 2 : i32
    %142 = arith.cmpi eq, %arg0, %c2_i32 : i32
    %143 = arith.extui %142 : i1 to i32
    %c0_i32_37 = arith.constant 0 : i32
    %144 = arith.cmpi ne, %143, %c0_i32_37 : i32
    scf.if %144 {
      %145 = vector.shape_cast %140 : vector<16x128xf32> to vector<2x8x128xf32>
      %cst_38 = arith.constant dense<0.000000e+00> : vector<2x128xf32>
      %146 = vector.multi_reduction <add>, %145, %cst_38 [1] : vector<2x8x128xf32> to vector<2x128xf32>
      %cst_39 = arith.constant 8.000000e+00 : f32
      %147 = vector.broadcast %cst_39 : f32 to vector<2x128xf32>
      %148 = arith.divf %146, %147 : vector<2x128xf32>
      %c8 = arith.constant 8 : index
      %c0_40 = arith.constant 0 : index
      %149 = vector.load %arg3[%c8, %c0_40] : memref<16x128xf32, #tpu.memory_space<vmem>>, vector<1x128xf32>
      %c0_41 = arith.constant 0 : index
      %c0_42 = arith.constant 0 : index
      %150 = vector.load %arg4[%c0_41, %c0_42] : memref<128x128xbf16, #tpu.memory_space<vmem>>, vector<128x128xbf16>
      %151 = arith.truncf %148 : vector<2x128xf32> to vector<2x128xbf16>
      %cst_43 = arith.constant dense<0.000000e+00> : vector<2x128xf32>
      %152 = tpu.matmul %151, %150, %cst_43 {dimension_numbers = #tpu.dot_dimension_numbers<[1], [0], [0], [1], [0, 0, 1, 1], [], []>} : vector<2x128xbf16>, vector<128x128xbf16>, vector<2x128xf32> -> vector<2x128xf32>
      %153 = vector.broadcast %149 : vector<1x128xf32> to vector<2x128xf32>
      %154 = arith.addf %152, %153 : vector<2x128xf32>
      %c0_44 = arith.constant 0 : index
      %c0_45 = arith.constant 0 : index
      %155 = vector.load %arg10[%c0_44, %c0_45] : memref<2x128xf32, #tpu.memory_space<vmem>>, vector<2x128xf32>
      tpu.vector_store %arg10[%c0_44, %c0_45], %154 {strides = array<i32>} : memref<2x128xf32, #tpu.memory_space<vmem>>, vector<2x128xf32>,
    } else {
    }
    return
  }
  func.func @transform_0(%arg0: i32) -> (i32, i32, i32) {
    %c0_i32 = arith.constant 0 : i32
    %c0_i32_0 = arith.constant 0 : i32
    %c0_i32_1 = arith.constant 0 : i32
    %c0_i32_2 = arith.constant 0 : i32
    return %c0_i32, %c0_i32_0, %c0_i32_1 : i32, i32, i32
  }
  func.func @transform_1(%arg0: i32) -> (i32, i32) {
    %c0_i32 = arith.constant 0 : i32
    %c0_i32_0 = arith.constant 0 : i32
    %c0_i32_1 = arith.constant 0 : i32
    return %c0_i32, %c0_i32_0 : i32, i32
  }
  func.func @transform_2(%arg0: i32) -> (i32, i32) {
    %c0_i32 = arith.constant 0 : i32
    %c0_i32_0 = arith.constant 0 : i32
    %c0_i32_1 = arith.constant 0 : i32
    return %c0_i32, %c0_i32_0 : i32, i32
  }
  func.func @transform_3(%arg0: i32) -> (i32, i32) {
    %c0_i32 = arith.constant 0 : i32
    %c0_i32_0 = arith.constant 0 : i32
    %c0_i32_1 = arith.constant 0 : i32
    return %c0_i32, %c0_i32_0 : i32, i32
  }
  func.func @transform_4(%arg0: i32) -> (i32, i32, i32) {
    %c0_i32 = arith.constant 0 : i32
    %c0_i32_0 = arith.constant 0 : i32
    %c0_i32_1 = arith.constant 0 : i32
    return %arg0, %c0_i32, %c0_i32_0 : i32, i32, i32
  }
  func.func @transform_5(%arg0: i32) -> (i32, i32, i32) {
    %c0_i32 = arith.constant 0 : i32
    %c0_i32_0 = arith.constant 0 : i32
    %c0_i32_1 = arith.constant 0 : i32
    return %arg0, %c0_i32, %c0_i32_0 : i32, i32, i32
  }
  func.func @transform_6(%arg0: i32) -> (i32, i32, i32) {
    %c0_i32 = arith.constant 0 : i32
    %c0_i32_0 = arith.constant 0 : i32
    %c0_i32_1 = arith.constant 0 : i32
    return %arg0, %c0_i32, %c0_i32_0 : i32, i32, i32
  }
  func.func @transform_7(%arg0: i32) -> (i32, i32, i32) {
    %c0_i32 = arith.constant 0 : i32
    %c0_i32_0 = arith.constant 0 : i32
    %c0_i32_1 = arith.constant 0 : i32
    return %arg0, %c0_i32, %c0_i32_0 : i32, i32, i32
  }
  func.func @transform_8(%arg0: i32) -> (i32, i32, i32) {
    %c0_i32 = arith.constant 0 : i32
    %c0_i32_0 = arith.constant 0 : i32
    %c0_i32_1 = arith.constant 0 : i32
    return %arg0, %c0_i32, %c0_i32_0 : i32, i32, i32
  }
  func.func @transform_9(%arg0: i32) -> (i32, i32) {
    %c0_i32 = arith.constant 0 : i32
    %c0_i32_0 = arith.constant 0 : i32
    %c0_i32_1 = arith.constant 0 : i32
    return %c0_i32, %c0_i32_0 : i32, i32
  }
}

</mosaic_0001>

<bundles_post_ra>
// kernel: forward.1
= control target key start
LH: loop header
LB: loop body
LE: loop exit
PB: predicated region body
PF: predicated region fallthrough
CT: control target
= control target key end

     0   :  { %s4699_s0 = inlined_call_operand.vmem [shape: f32[2,16,8], index: 0, kind: input, shape index: {}]   ;;  %s4700_s1 = inlined_call_operand.vmem [shape: bf16[16,128], index: 1, kind: input, shape index: {}]   ;;  %s4701_s2 = inlined_call_operand.vmem [shape: f32[16,128], index: 2, kind: input, shape index: {}]   ;;  %s4702_s3 = inlined_call_operand.hbm [shape: bf16[128,128], index: 3, kind: input, shape index: {}]   ;;  %s4703_s4 = inlined_call_operand.hbm [shape: bf16[3,128,384], index: 4, kind: input, shape index: {}]   ;;  %s4704_s5 = inlined_call_operand.hbm [shape: bf16[3,128,128], index: 5, kind: input, shape index: {}]   ;;  %s4705_s6 = inlined_call_operand.hbm [shape: bf16[3,128,512], index: 6, kind: input, shape index: {}]   ;;  %s4706_s7 = inlined_call_operand.hbm [shape: bf16[3,512,128], index: 7, kind: input, shape index: {}]   ;;  %s4707_s8 = inlined_call_operand.hbm [shape: f32[3,8,512], index: 8, kind: input, shape index: {}]   ;;  %s4708_s9 = inlined_call_operand.hbm [shape: f32[2,128], index: 9, kind: output, shape index: {}]  }
   0x1   :  { %4716 = sst [smem:[#allocation23_spill]] %s4700_s1 }
   0x2   :  { %4717 = sst [smem:[#allocation24_spill]] %s4701_s2 }
   0x3   :  { %4718 = sst [smem:[#allocation25_spill]] %s4703_s4 }
   0x4   :  { %4719 = sst [smem:[#allocation26_spill]] %s4705_s6 }
   0x5   :  { %4720 = sst [smem:[#allocation27_spill]] %s4708_s9 }
   0x6   :  { %14 = vsyncpa [#allocation4], 0 }
   0x7   :  { %15 = vsyncpa [#allocation7], 0 }
   0x8   :  { %17 = vsyncpa [#allocation7 + $0x1], 0 }
   0x9   :  { %18 = vsyncpa [#allocation10], 0 }
   0xa   :  { %20 = vsyncpa [#allocation10 + $0x1], 0 }
   0xb   :  { %21 = vsyncpa [#allocation13], 0 }
   0xc   :  { %23 = vsyncpa [#allocation13 + $0x1], 0 }
   0xd   :  { %24 = vsyncpa [#allocation5], 0  ;;  %s4049_s30 = smov 0   ;;  %s4051_s10 = smov 0  }
   0xe   :  { %s4053_s11 = smov 0   ;;  %s4055_s12 = smov 0  }
   0xf LB: > { %4721 = sst [smem:[#allocation20_spill]] %s3970_s11  ;;  %s4070_s13 = sadd.s32 1, %s3974_s12   ;;  %s3974_s12 = sphi %s4055_s12, %s4741_s12   ;;  %s3970_s11 = sphi %s4053_s11, %s4743_s11   ;;  %s3966_s10 = sphi %s4051_s10, %s4745_s10   ;;  %s3962_s30 = sphi %s4049_s30, %s4744_s30  }
  0x10   : > { %4722 = sst [smem:[#allocation21_spill]] %s4070_s13  ;;  %s121_s14 = sadd.s32 1, %s3970_s11 }
  0x11   : > { %s118_s15 = ssub.s32 %s3974_s12, %s4070_s13  ;;  %p128_p0 = scmp.ne.s32.totalorder %s3970_s11, %s3966_s10 }
  0x12   : > { %p119_p1 = scmp.eq.s32.totalorder %s118_s15, 0  ;;  %p129_p2 = scmp.eq.s32.totalorder %s3974_s12, 0 }
  0x13   : > { %p3443_p3 = scmp.lt.s32.totalorder %s3974_s12, 3  ;;  %s4709_s17 = sand.u32 1, %s3974_s12  }
  0x14   : > { %s4080_s16 = scalar_select %p119_p1, %s3970_s11, %s121_s14  }
  0x15   : > { %p130_p4 = por %p129_p2, %p128_p0  ;;  %s4084_s18 = sand.u32 1, %s3970_s11  }
  0x16   : > { %4723 = sst [smem:[#allocation22_spill]] %s4080_s16  ;;  %s3401_s19 = smul.u32 192, %s4084_s18 }
  0x17   : > { %p4087_p5 = pnand %p3443_p3, %p130_p4  ;;  %s3402_s21 = smul.u32 3072, %s3974_s12 }
  0x18   : > { %s4725_s4 = sld [smem:[#allocation25_spill]]  ;;  %s309_s25 = scalar_lea.vmem [#allocation6], %s3401_s19 }
  0x19   : > { %s316_s26 = sshll.u32 %s309_s25, 4  ;;  %s4101_s27 = scalar_lea.sflag [#allocation7], %s4709_s17  ;;  %s4097_s26 = int_to_ptr.vmem [resolvable:$true] %s316_s26 }
  0x1a   : > { %p4107_p7 = pneg %p4087_p5 }
  0x1e   : > { %s4095_s24 = scalar_lea.hbm %s4725_s4, %s3402_s21  ;;  %s3739_s19 = scalar_lea.hbm %s4725_s4, 9216 }
  0x1f   : > { %s3734_s28 = scalar_lea.hbm %s4095_s24, 3072  ;;  %p3740_p10 = scmp.lt.s32.totalorder %s4095_s24, %s4725_s4 }
  0x20   : > { %p3735_p6 = scmp.ne.s32.totalorder %s4095_s24, %s3734_s28  ;;  %p3741_p11 = scmp.lt.s32.totalorder %s3739_s19, %s3734_s28 }
  0x22   : > { %p3737_p8 = pnand %p4107_p7, %p3735_p6  ;;  %p3742_p12 = por %p3741_p11, %p3740_p10 }
  0x24   : > { %p3738_p9 = pneg %p3737_p8 }
  0x26   : > { %p3743_p13 = pnand %p3742_p12, %p3738_p9 }
  0x28   : > { %3746 = shalt.err (!%p3743_p13)
}
  0x29   : > { %s3747_s23 = scalar_lea.vmem %s4097_s26, 3072  ;;  %s3976_s25 = smov [#allocation6]  }
  0x2a   : > { %p3748_p0 = scmp.ne.s32.totalorder %s4097_s26, %s3747_s23  ;;  %s3752_s14 = sshll.u32 %s3976_s25, 4  ;;  %s3753_s14 = int_to_ptr.vmem [resolvable:$false] %s3752_s14 }
  0x2b   : > { %s3754_s15 = scalar_lea.vmem %s3753_s14, 6144  ;;  %p3755_p3 = scmp.lt.s32.totalorder %s4097_s26, %s3753_s14 }
  0x2c   : > { %p3750_p1 = pnand %p3748_p0, %p4107_p7  ;;  %p3756_p4 = scmp.lt.s32.totalorder %s3754_s15, %s3747_s23 }
  0x2e   : > { %p3751_p2 = pneg %p3750_p1  ;;  %p3757_p6 = por %p3756_p4, %p3755_p3 }
  0x30   : > { %p3758_p8 = pnand %p3757_p6, %p3751_p2 }
  0x32   : > { %3761 = shalt.err (!%p3758_p8)
}
  0x33   : > { %s3977_s28 = smov 192   ;;  %s3978_s19 = smov 12  }
  0x34   : > { %3429 = dma.hbm_to_vmem [thread:$0]  (!%p4087_p5), %s4095_s24, 3072, %s4097_s26, %s4101_s27, %s3977_s28, %s3977_s28, %s3978_s19  }
  0x35   : > { %s2986_s21 = sshll.u32 %s4084_s18, 8  ;;  %s3131_s22 = sshll.u32 %s3974_s12, 12 }
  0x36   : > { %s4727_s6 = sld [smem:[#allocation26_spill]]  ;;  %s351_s15 = scalar_lea.vmem [#allocation9], %s2986_s21 }
  0x37   : > { %s358_s17 = sshll.u32 %s351_s15, 4  ;;  %s4728_s4 = sand.u32 1, %s3974_s12   ;;  %s4141_s17 = int_to_ptr.vmem [resolvable:$true] %s358_s17 }
  0x38   : > { %s4145_s16 = scalar_lea.sflag [#allocation10], %s4728_s4 }
  0x3c   : > { %s4137_s14 = scalar_lea.hbm %s4727_s6, %s3131_s22  ;;  %s3767_s19 = scalar_lea.hbm %s4727_s6, 12288 }
  0x3d   : > { %s3762_s24 = scalar_lea.hbm %s4137_s14, 4096  ;;  %p3768_p12 = scmp.lt.s32.totalorder %s4137_s14, %s4727_s6 }
  0x3e   : > { %p3763_p9 = scmp.ne.s32.totalorder %s4137_s14, %s3762_s24  ;;  %p3769_p13 = scmp.lt.s32.totalorder %s3767_s19, %s3762_s24 }
  0x40   : > { %p3765_p10 = pnand %p3763_p9, %p4107_p7  ;;  %p3770_p0 = por %p3769_p13, %p3768_p12 }
  0x42   : > { %p3766_p11 = pneg %p3765_p10 }
  0x44   : > { %p3771_p1 = pnand %p3770_p0, %p3766_p11 }
  0x46   : > { %3774 = shalt.err (!%p3771_p1)
}
  0x47   : > { %s3775_s4 = scalar_lea.vmem %s4141_s17, 4096  ;;  %s3979_s15 = smov [#allocation9]  }
  0x48   : > { %p3776_p2 = scmp.ne.s32.totalorder %s4141_s17, %s3775_s4  ;;  %s3780_s26 = sshll.u32 %s3979_s15, 4  ;;  %s3781_s26 = int_to_ptr.vmem [resolvable:$false] %s3780_s26 }
  0x49   : > { %s3782_s28 = scalar_lea.vmem %s3781_s26, 8192  ;;  %p3783_p6 = scmp.lt.s32.totalorder %s4141_s17, %s3781_s26 }
  0x4a   : > { %p3778_p3 = pnand %p3776_p2, %p4107_p7  ;;  %p3784_p8 = scmp.lt.s32.totalorder %s3782_s28, %s3775_s4 }
  0x4c   : > { %p3779_p4 = pneg %p3778_p3  ;;  %p3785_p9 = por %p3784_p8, %p3783_p6 }
  0x4e   : > { %p3786_p10 = pnand %p3785_p9, %p3779_p4 }
  0x50   : > { %3789 = shalt.err (!%p3786_p10)
}
  0x51   : > { %s3980_s24 = smov 256   ;;  %s3981_s19 = smov 16  }
  0x52   : > { %3435 = dma.hbm_to_vmem [thread:$0]  (!%p4087_p5), %s4137_s14, 4096, %s4141_s17, %s4145_s16, %s3980_s24, %s3980_s24, %s3981_s19  }
  0x53   : > { %s4173_s4 = scalar_lea.hbm %s4706_s7, %s3131_s22  ;;  %s372_s15 = scalar_lea.vmem [#allocation11], %s2986_s21 }
  0x54   : > { %s379_s26 = sshll.u32 %s372_s15, 4  ;;  %s4180_s28 = sadd.s32 4294967295, %s3974_s12   ;;  %s4177_s26 = int_to_ptr.vmem [resolvable:$true] %s379_s26 }
  0x55   : > { %p134_p11 = scmp.ne.s32.totalorder %s3966_s10, %s3962_s30  ;;  %p4713_p12 = scmp.eq.s32.totalorder %s4180_s28, 0 }
  0x56   : > { %p2979_p13 = scmp.ge.s32.totalorder %s3974_s12, 1  ;;  %p270_p0 = scmp.lt.s32.totalorder %s3974_s12, 4 }
  0x57   : > { %p4189_p1 = por %p4713_p12, %p134_p11  ;;  %s3982_s22 = smov [#allocation3]  }
  0x58   : > { %p4194_p3 = pnand %p2979_p13, %p270_p0  ;;  %s291_s14 = sshll.u32 %s3982_s22, 4  ;;  %s292_s14 = int_to_ptr.vmem [resolvable:$true] %s291_s14 }
  0x59   : > { %s4729_s17 = scalar_select %p4189_p1, 1, 0 }
  0x5a   : > { %s4730_s21 = scalar_select %p4194_p3, 1, 0 }
  0x5b   : > { %p3422_p4 = pneg %p4194_p3  ;;  %s2983_s30 = sshll.u32 %s4084_s18, 6 }
  0x5c   : > { %s3130_s19 = sshll.u32 %s3974_s12, 10  ;;  %s330_s23 = scalar_lea.vmem [#allocation8], %s2983_s30 }
  0x5d   : > { %p4203_p6 = pnand %p3422_p4, %p4713_p12  ;;  %s337_s25 = sshll.u32 %s330_s23, 4  ;;  %s338_s25 = int_to_ptr.vmem [resolvable:$true] %s337_s25 }
  0x5e   : > { %s4211_s11 = scalar_lea.hbm %s4704_s5, %s3130_s19  ;;  %s3801_s22 = scalar_lea.vmem %s292_s14, 1024 }
  0x5f   : > { %p3792_p8 = pneg %p4203_p6  ;;  %p3802_p9 = scmp.ne.s32.totalorder %s292_s14, %s3801_s22 }
  0x60   : > { %p3809_p13 = scmp.lt.s32.totalorder %s292_s14, %s292_s14  ;;  %p3810_p0 = scmp.lt.s32.totalorder %s3801_s22, %s3801_s22 }
  0x61   : > { %p3804_p10 = pnand %p3802_p9, %p3792_p8 }
  0x62   : > { %p3811_p4 = por %p3810_p0, %p3809_p13 }
  0x63   : > { %p3805_p11 = pneg %p3804_p10 }
  0x65   : > { %p3812_p2 = pnand %p3811_p4, %p3805_p11 }
  0x67   : > { %3815 = shalt.err (!%p3812_p2)
}
  0x68   : > { %s3983_s13 = smov 64   ;;  %s3984_s6 = smov 4  }
  0x69   : > { %3425 = dma.hbm_to_vmem [thread:$0]  (!%p4203_p6), %s4702_s3, 1024, %s292_s14, [#allocation4], %s3983_s13, %s3983_s13, %s3984_s6  }
  0x6a   : > { %s3816_s23 = scalar_lea.hbm %s4211_s11, 1024  ;;  %s3821_s9 = scalar_lea.hbm %s4704_s5, 3072 }
  0x6b   : > { %p3817_p8 = scmp.ne.s32.totalorder %s4211_s11, %s3816_s23  ;;  %p3822_p10 = scmp.lt.s32.totalorder %s4211_s11, %s4704_s5 }
  0x6c   : > { %p3823_p11 = scmp.lt.s32.totalorder %s3821_s9, %s3816_s23 }
  0x6d   : > { %p3819_p2 = pnand %p3817_p8, %p4107_p7 }
  0x6e   : > { %p3824_p13 = por %p3823_p11, %p3822_p10 }
  0x6f   : > { %p3820_p9 = pneg %p3819_p2 }
  0x71   : > { %p3825_p0 = pnand %p3824_p13, %p3820_p9 }
  0x73   : > { %3828 = shalt.err (!%p3825_p0)
}
  0x74   : > { %s3829_s24 = scalar_lea.vmem %s338_s25, 1024  ;;  %s3985_s14 = smov [#allocation8]  }
  0x75   : > { %p3830_p6 = scmp.ne.s32.totalorder %s338_s25, %s3829_s24  ;;  %s3834_s30 = sshll.u32 %s3985_s14, 4  ;;  %s3835_s30 = int_to_ptr.vmem [resolvable:$false] %s3834_s30 }
  0x76   : > { %s3836_s19 = scalar_lea.vmem %s3835_s30, 2048  ;;  %p3837_p8 = scmp.lt.s32.totalorder %s338_s25, %s3835_s30 }
  0x77   : > { %p3832_p4 = pnand %p3830_p6, %p4107_p7  ;;  %p3838_p2 = scmp.lt.s32.totalorder %s3836_s19, %s3829_s24 }
  0x79   : > { %p3833_p12 = pneg %p3832_p4  ;;  %p3839_p1 = por %p3838_p2, %p3837_p8 }
  0x7b   : > { %p3840_p3 = pnand %p3839_p1, %p3833_p12 }
  0x7d   : > { %3843 = shalt.err (!%p3840_p3)
}
  0x7e   : > { %3432 = dma.hbm_to_vmem [thread:$0]  (!%p4087_p5), %s4211_s11, 1024, %s338_s25, %s4101_s27, %s3983_s13, %s3983_s13, %s3984_s6  }
  0x7f   : > { %s3844_s1 = scalar_lea.hbm %s4173_s4, 4096  ;;  %s3849_s23 = scalar_lea.hbm %s4706_s7, 12288 }
  0x80   : > { %p3845_p9 = scmp.ne.s32.totalorder %s4173_s4, %s3844_s1  ;;  %p3850_p12 = scmp.lt.s32.totalorder %s4173_s4, %s4706_s7 }
  0x81   : > { %p3851_p1 = scmp.lt.s32.totalorder %s3849_s23, %s3844_s1 }
  0x82   : > { %p3847_p10 = pnand %p3845_p9, %p4107_p7 }
  0x83   : > { %p3852_p3 = por %p3851_p1, %p3850_p12 }
  0x84   : > { %p3848_p11 = pneg %p3847_p10 }
  0x86   : > { %p3853_p13 = pnand %p3852_p3, %p3848_p11 }
  0x88   : > { %3856 = shalt.err (!%p3853_p13)
}
  0x89   : > { %s3857_s11 = scalar_lea.vmem %s4177_s26, 4096  ;;  %s3986_s27 = smov [#allocation11]  }
  0x8a   : > { %p3858_p0 = scmp.ne.s32.totalorder %s4177_s26, %s3857_s11  ;;  %s3862_s25 = sshll.u32 %s3986_s27, 4  ;;  %s3863_s25 = int_to_ptr.vmem [resolvable:$false] %s3862_s25 }
  0x8b   : > { %s3864_s24 = scalar_lea.vmem %s3863_s25, 8192  ;;  %p3865_p8 = scmp.lt.s32.totalorder %s4177_s26, %s3863_s25 }
  0x8c   : > { %p3860_p6 = pnand %p3858_p0, %p4107_p7  ;;  %p3866_p2 = scmp.lt.s32.totalorder %s3864_s24, %s3857_s11 }
  0x8e   : > { %p3861_p4 = pneg %p3860_p6  ;;  %p3867_p9 = por %p3866_p2, %p3865_p8 }
  0x90   : > { %p3868_p10 = pnand %p3867_p9, %p3861_p4 }
  0x92   : > { %3871 = shalt.err (!%p3868_p10)
}
  0x93   : > { %3438 = dma.hbm_to_vmem [thread:$0]  (!%p4087_p5), %s4173_s4, 4096, %s4177_s26, %s4145_s16, %s3983_s13, %s3983_s13, %s3984_s6  }
  0x94   : > { %s2992_s14 = sshll.u32 %s4084_s18, 5  ;;  %s3133_s30 = sshll.u32 %s3974_s12, 9 }
  0x95   : > { %s4272_s2 = scalar_lea.hbm %s4707_s8, %s3133_s30  ;;  %s393_s9 = scalar_lea.vmem [#allocation12], %s2992_s14 }
  0x96   : > { %s401_s23 = sshll.u32 %s393_s9, 4  ;;  %s390_s15 = scalar_lea.sflag [#allocation13], %s4084_s18  ;;  %s402_s23 = int_to_ptr.vmem [resolvable:$true] %s401_s23 }
  0x97   : > { %s3872_s22 = scalar_lea.hbm %s4272_s2, 512  ;;  %s3877_s12 = scalar_lea.hbm %s4707_s8, 1536 }
  0x98   : > { %p3873_p11 = scmp.ne.s32.totalorder %s4272_s2, %s3872_s22  ;;  %p3878_p3 = scmp.lt.s32.totalorder %s4272_s2, %s4707_s8 }
  0x99   : > { %p3879_p13 = scmp.lt.s32.totalorder %s3877_s12, %s3872_s22 }
  0x9a   : > { %p3875_p12 = pnand %p3873_p11, %p4107_p7 }
  0x9b   : > { %p3880_p0 = por %p3879_p13, %p3878_p3 }
  0x9c   : > { %p3876_p1 = pneg %p3875_p12 }
  0x9e   : > { %p3881_p6 = pnand %p3880_p0, %p3876_p1 }
  0xa0   : > { %3884 = shalt.err (!%p3881_p6)
}
  0xa1   : > { %s3885_s6 = scalar_lea.vmem %s402_s23, 512  ;;  %s3987_s18 = smov [#allocation12]  }
  0xa2   : > { %p3886_p4 = scmp.ne.s32.totalorder %s402_s23, %s3885_s6  ;;  %s3890_s11 = sshll.u32 %s3987_s18, 4  ;;  %s3891_s11 = int_to_ptr.vmem [resolvable:$false] %s3890_s11 }
  0xa3   : > { %s3892_s27 = scalar_lea.vmem %s3891_s11, 1024  ;;  %p3893_p9 = scmp.lt.s32.totalorder %s402_s23, %s3891_s11 }
  0xa4   : > { %p3888_p8 = pnand %p3886_p4, %p4107_p7  ;;  %p3894_p10 = scmp.lt.s32.totalorder %s3892_s27, %s3885_s6 }
  0xa6   : > { %p3889_p2 = pneg %p3888_p8  ;;  %p3895_p11 = por %p3894_p10, %p3893_p9 }
  0xa8   : > { %p3896_p12 = pnand %p3895_p11, %p3889_p2 }
  0xaa   : > { %3899 = shalt.err (!%p3896_p12)
}
  0xab   : > { %3441 = dma.hbm_to_vmem [thread:$0]  (!%p4087_p5), %s4272_s2, 512, %s402_s23, %s390_s15  }
  0xac   : > { %p4732_p1 = scmp.ne.s32.totalorder %s4730_s21, 0 }
  0xad   : > { %p4733_p3 = scmp.eq.s32.totalorder (!%p4732_p1), %s4180_s28, 0 }
  0xae   : > { %410 = sbr.rel (%p4732_p1) target bundleno = 3260 (0xcbc), region = 56 }
  0xb3   : > { %3941 = dma.done.wait (%p4733_p3), [#allocation4], 1024   ;;  %p4734_p7 = pmov %p4733_p3 }
  0xb4   : > { %s416_s29 = sand.u32 1, %s4180_s28   ;;  %s418_s25 = sand.u32 1, %s3966_s10  }
  0xb5   : > { %3943 = vsyncadd (%p4734_p7), [#allocation4], 4294966272  ;;  %s3403_s24 = smul.u32 192, %s418_s25  ;;  %s417_s14 = scalar_lea.sflag [#allocation7], %s416_s29 }
  0xb6   : > { %p4735_p13 = scmp.ne.s32.totalorder %s4729_s17, 0 }
  0xb7   : > { %s4299_s30 = scalar_lea.vmem [#allocation6], %s3403_s24 }
  0xb8   : > { %3945 = dma.done.wait (%p4735_p13), %s417_s14, 4096  }
  0xb9   : > { %3947 = vsyncadd (%p4735_p13), %s417_s14, 4294963200  ;;  %s2997_s20 = sshll.u32 %s418_s25, 6  ;;  %s2998_s21 = sshll.u32 %s418_s25, 8 }
  0xba   : > { %s4305_s19 = scalar_lea.vmem [#allocation8], %s2997_s20  ;;  %s435_s1 = scalar_lea.sflag [#allocation10], %s416_s29 }
  0xbb   : > { %s4307_s2 = scalar_lea.vmem [#allocation9], %s2998_s21 }
  0xbc   : > { %3949 = dma.done.wait (%p4735_p13), %s435_s1, 8192  }
  0xbd   : > { %3951 = vsyncadd (%p4735_p13), %s435_s1, 4294959104  ;;  %s3000_s9 = sshll.u32 %s418_s25, 5  ;;  %s4313_s23 = scalar_lea.vmem [#allocation11], %s2998_s21 }
  0xbe   : > { %s453_s15 = scalar_lea.sflag [#allocation13], %s418_s25  ;;  %s4315_s22 = scalar_lea.vmem [#allocation12], %s3000_s9 }
  0xbf   : > { %3953 = dma.done.wait (%p4735_p13), %s453_s15, 512  }
  0xc0   : > { %3955 = vsyncadd (%p4735_p13), %s453_s15, 4294966784  ;;  %p4736_p5 = scmp.ne.s32.totalorder %s4180_s28, 0 }
  0xc1   : > { %s4737_s29 = sld [smem:[#allocation23_spill]] (!%p4736_p5) }
  0xc2   : > { %510 = sbr.rel (%p4736_p5) target bundleno = 531 (0x213), region = 84  ;;  %s4738_s14 = sld [smem:[#allocation24_spill]] (!%p4736_p5) }
  0xc7   : > { %v511_v0 = vld [vmem:[%s4699_s0] sm:$0xff]  ;;  %v513_v1 = vld [vmem:[%s4699_s0 + $0x10] sm:$0xff]  ;;  %v512_v2 = vld [vmem:[%s4699_s0 + $0x8] sm:$0xff]  ;;  %v3988_v5 = vmov 0.0   ;;  %vm3989_vm0 = vmmov 0   ;;  %vm589_vm1 = vcmask 130048  }
  0xc8   : > { %v3497_v3 = vpack.i.bf16 %v513_v1, %v511_v0  ;;  %v514_v4 = vld [vmem:[%s4699_s0 + $0x18] sm:$0xff]  ;;  %3239 = vmatprep.subr.bf16.mxu0 %v3988_v5  ;;  %v3506_v6 = vld [vmem:[%s4737_s29] sm:$0xff]   ;;  %3241 = vmatprep.mubr.msk.bf16.mxu0 %vm3989_vm0, %v3988_v5 }
  0xc9   : > { %v3499_v7 = vpack.i.bf16 %v514_v4, %v512_v2  ;;  %3240 = vmatpush3.bf16.msra.mxu0 %v3506_v6  ;;  %v582_v12 = vld [vmem:[%s4738_s14] sm:$0xff] }
  0xca   : > { %3498 = vxpose.xlu0.b32.start [1/2] (short) (narrow) %v3497_v3, 8 }
  0xce   : > { %3500 = vxpose.xlu0.b32.end [2/2] (short) (narrow) %v3499_v7, 8 }
 0x146   : > { %v3501_v8 = vpop.trf.xlu0 }
 0x147   : > { %v3505_v9 = vunpack.i.h.bf16 %v3501_v8  ;;  %v3502_v10 = vunpack.i.l.bf16 %v3501_v8 }
 0x149   : > { %v581_v11 = vpack.c.bf16 %v3505_v9, %v3502_v10 }
 0x14b   : > { %3242 = vmatmul.mubr.msk.bf16.vlgmr.msra.gmra.mxu0 %vm589_vm1, %v581_v11 }
 0x20b   : > { %v627_v13 = vpop.f32.mrf.mxu0 }
 0x20c   : > { %v628_v14 = vadd.f32 %v627_v13, %v582_v12 }
 0x20d   : > { %v3243_v15 = vpop.f32.mrf.mxu0 }
 0x20e   : > { %634 = vst [vmem:[#allocation2] sm:$0xff] %v628_v14 }
 0x20f   : > { %v630_v16 = vpop.f32.mrf.mxu0 }
 0x210   : > { %v631_v17 = vadd.f32 %v630_v16, %v582_v12 }
 0x211   : > { %v3244_v18 = vpop.f32.mrf.mxu0 }
 0x212   : > { %635 = vst [vmem:[#allocation2 + $0x8] sm:$0xff] %v631_v17 }
 0x213 PF: > { %v3562_v19 = vld [vmem:[%s4299_s30 + $0xac] ss:$12 sps:$4 sm:$0xff]   ;;  %v3564_v20 = vld [vmem:[%s4299_s30 + $0xa8] ss:$12 sps:$4 sm:$0xff]   ;;  %v3990_v21 = vmov 0   ;;  %v3991_v22 = vmov 0.0   ;;  %v675_v48 = vlaneseq }
 0x214   : > { %847 = vmatprep.mubr.bf16.mxu0 %v3990_v21  ;;  %3245 = vmatprep.subr.bf16.mxu1 %v3991_v22  ;;  %v3565_v23 = vld [vmem:[%s4299_s30 + $0x94] ss:$12 sps:$4 sm:$0xff]   ;;  %v3567_v24 = vld [vmem:[%s4299_s30 + $0x90] ss:$12 sps:$4 sm:$0xff]   ;;  %v3570_v26 = vld [vmem:[%s4299_s30 + $0x78] ss:$12 sps:$4 sm:$0xff]  }
 0x215   : > { %815 = vmatprep.subr.bf16.mxu0 %v3562_v19  ;;  %v3568_v25 = vld [vmem:[%s4299_s30 + $0x7c] ss:$12 sps:$4 sm:$0xff]   ;;  %v3571_v27 = vld [vmem:[%s4299_s30 + $0x64] ss:$12 sps:$4 sm:$0xff]   ;;  %v3573_v28 = vld [vmem:[%s4299_s30 + $0x60] ss:$12 sps:$4 sm:$0xff]  }
 0x216   : > { %816 = vmatpush1.bf16.msra.mxu0 %v3564_v20  ;;  %v3574_v29 = vld [vmem:[%s4299_s30 + $0x4c] ss:$12 sps:$4 sm:$0xff]   ;;  %v3586_v30 = vld [vmem:[%s4299_s30 + $0xb0] ss:$12 sps:$4 sm:$0xff]   ;;  %v3576_v32 = vld [vmem:[%s4299_s30 + $0x48] ss:$12 sps:$4 sm:$0xff]  }
 0x217   : > { %817 = vmatprep.subr.bf16.mxu0 %v3565_v23  ;;  %3246 = vmatpush3.bf16.msra.mxu1 %v3586_v30  ;;  %v3587_v31 = vld [vmem:[%s4299_s30 + $0x98] ss:$12 sps:$4 sm:$0xff]   ;;  %v3577_v33 = vld [vmem:[%s4299_s30 + $0x34] ss:$12 sps:$4 sm:$0xff]   ;;  %v3579_v34 = vld [vmem:[%s4299_s30 + $0x30] ss:$12 sps:$4 sm:$0xff]  }
 0x218   : > { %3247 = vmatprep.subr.bf16.mxu1 %v3991_v22  ;;  %v3588_v35 = vld [vmem:[%s4299_s30 + $0x80] ss:$12 sps:$4 sm:$0xff]   ;;  %v3580_v36 = vld [vmem:[%s4299_s30 + $0x1c] ss:$12 sps:$4 sm:$0xff]   ;;  %v3582_v38 = vld [vmem:[%s4299_s30 + $0x18] ss:$12 sps:$4 sm:$0xff]  }
 0x219   : > { %v3589_v37 = vld [vmem:[%s4299_s30 + $0x68] ss:$12 sps:$4 sm:$0xff]   ;;  %v3583_v39 = vld [vmem:[%s4299_s30 + $0x4] ss:$12 sps:$4 sm:$0xff]   ;;  %v3585_v41 = vld [vmem:[%s4299_s30] ss:$12 sps:$4 sm:$0xff]  }
 0x21a   : > { %818 = vmatpush1.bf16.msra.mxu0 %v3567_v24  ;;  %v3590_v40 = vld [vmem:[%s4299_s30 + $0x50] ss:$12 sps:$4 sm:$0xff]   ;;  %v3591_v44 = vld [vmem:[%s4299_s30 + $0x38] ss:$12 sps:$4 sm:$0xff]   ;;  %v3592_v46 = vld [vmem:[%s4299_s30 + $0x20] ss:$12 sps:$4 sm:$0xff]  }
 0x21b   : > { %819 = vmatprep.subr.bf16.mxu0 %v3568_v25  ;;  %3248 = vmatpush3.bf16.msra.mxu1 %v3587_v31  ;;  %v640_v42 = vld [vmem:[#allocation2] sm:$0xff]  ;;  %v641_v43 = vld [vmem:[#allocation2 + $0x8] sm:$0xff]  ;;  %vm3992_vm2 = vmmov 0   ;;  %v4382_v49 = vshrl.u32 %v675_v48, 7  ;;  %v637_v50 = vld [vmem:[%s4315_s22 + $0x8] sm:$0xff]  ;;  %vm983_vm3 = vcmask 261120  }
 0x21c   : > { %3249 = vmatprep.subr.bf16.mxu1 %v3991_v22  ;;  %v674_v45 = vpack.c.bf16 %v641_v43, %v640_v42  ;;  %v3593_v47 = vld [vmem:[%s4299_s30 + $0x8] ss:$12 sps:$4 sm:$0xff]   ;;  %3261 = vmatprep.mubr.msk.bf16.mxu1 %vm3992_vm2, %v3991_v22  ;;  %v4390_v53 = vld [vmem:[%s4315_s22] sm:$0xff]  ;;  %s3993_s30 = smov 96   ;;  %s3994_s20 = smov 64   ;;  %vm1452_vm4 = vcmask 1043456  }
 0x21d   : > { %v4386_v51 = vsub.s32 1, %v4382_v49  ;;  %s3995_s21 = smov 32   ;;  %vm1352_vm5 = vcmask 64512   ;;  %vm1844_vm6 = vcmask 523264   ;;  %vm1847_vm7 = vcmask 785408   ;;  %p3116_p0 = scmp.ne.s32.totalorder %s4180_s28, 2 }
 0x21e   : > { %820 = vmatpush1.bf16.msra.mxu0 %v3570_v26 }
 0x21f   : > { %821 = vmatprep.subr.bf16.mxu0 %v3571_v27  ;;  %3250 = vmatpush3.bf16.msra.mxu1 %v3588_v35  ;;  %v682_v52 = vrot.slane %v637_v50, %v4386_v51  ;;  %v678_v56 = vrot.slane %v4390_v53, %v4386_v51 }
 0x220   : > { %3251 = vmatprep.subr.bf16.mxu1 %v3991_v22 }
 0x222   : > { %822 = vmatpush1.bf16.msra.mxu0 %v3573_v28 }
 0x223   : > { %823 = vmatprep.subr.bf16.mxu0 %v3574_v29  ;;  %3252 = vmatpush3.bf16.msra.mxu1 %v3589_v37 }
 0x224   : > { %3253 = vmatprep.subr.bf16.mxu1 %v3991_v22 }
 0x226   : > { %824 = vmatpush1.bf16.msra.mxu0 %v3576_v32  ;;  %v4419_v32 = vld [vmem:[%s4315_s22 + $0x10] sm:$0xff] }
 0x227   : > { %825 = vmatprep.subr.bf16.mxu0 %v3577_v33  ;;  %3254 = vmatpush3.bf16.msra.mxu1 %v3590_v40  ;;  %v686_v35 = vrot.slane %v4419_v32, %v4386_v51 }
 0x228   : > { %3255 = vmatprep.subr.bf16.mxu1 %v3991_v22 }
 0x22a   : > { %826 = vmatpush1.bf16.msra.mxu0 %v3579_v34 }
 0x22b   : > { %827 = vmatprep.subr.bf16.mxu0 %v3580_v36  ;;  %3256 = vmatpush3.bf16.msra.mxu1 %v3591_v44 }
 0x22c   : > { %3257 = vmatprep.subr.bf16.mxu1 %v3991_v22 }
 0x22e   : > { %828 = vmatpush1.bf16.msra.mxu0 %v3582_v38 }
 0x22f   : > { %829 = vmatprep.subr.bf16.mxu0 %v3583_v39  ;;  %3258 = vmatpush3.bf16.msra.mxu1 %v3592_v46 }
 0x230   : > { %3259 = vmatprep.subr.bf16.mxu1 %v3991_v22 }
 0x232   : > { %830 = vmatpush1.bf16.msra.mxu0 %v3585_v41 }
 0x233   : > { %3289 = vmatprep.subr.bf16.mxu0 %v3991_v22  ;;  %3260 = vmatpush3.bf16.msra.mxu1 %v3593_v47 }
 0x234   : > { %3265 = vmatprep.subr.bf16.mxu1 %v3991_v22 }
 0x235   : > { %848 = vmatmul.mubr.bf16.vlgmr.msra.gmra.mxu0 %v674_v45 }
 0x236   : > { %3291 = vmatprep.mubr.msk.bf16.mxu0 %vm3992_vm2, %v3991_v22  ;;  %3262 = vmatmul.mubr.bf16.vlgmr.msra.gmra.mxu1 %v674_v45 }
 0x237   : > { %3267 = vmatprep.mubr.msk.bf16.mxu1 %vm3992_vm2, %v3991_v22 }
 0x2f5   : > { %v849_v54 = vpop.f32.mrf.mxu0 }
 0x2f6   : > { %v850_v62 = vadd.f32 %v849_v54, %v678_v56  ;;  %v892_v8 = vpop.f32.mrf.mxu1 }
 0x2f7   : > { %v851_v55 = vpop.f32.mrf.mxu0  ;;  %v4427_v42 = vadd.f32 %v892_v8, %v686_v35 }
 0x2f8   : > { %v852_v57 = vadd.f32 %v851_v55, %v682_v52  ;;  %v919_v5 = vpack.c.bf16 %v850_v62, %v850_v62  ;;  %v3263_v9 = vpop.f32.mrf.mxu1 }
 0x2f9   : > { %v853_v58 = vpop.f32.mrf.mxu0  ;;  %v975_v47 = vpack.c.bf16 %v4427_v42, %v4427_v42 }
 0x2fa   : > { %v854_v59 = vadd.f32 %v853_v58, %v678_v56  ;;  %929 = vrot.lane.b32.xlu0 %v852_v57, %s3993_s30  ;;  %v947_v60 = vpack.c.bf16 %v852_v57, %v852_v57  ;;  %v895_v10 = vpop.f32.mrf.mxu1 }
 0x2fb   : > { %v855_v61 = vpop.f32.mrf.mxu0  ;;  %v4439_v50 = vadd.f32 %v895_v10, %v686_v35  ;;  %v1454_v54 = vsel %vm1452_vm4, %v975_v47, 0 }
 0x2fc   : > { %v856_v63 = vadd.f32 %v855_v61, %v682_v52  ;;  %903 = vrot.lane.b32.xlu1 %v854_v59, %s3993_s30  ;;  %v988_v0 = vsel %vm983_vm3, %v947_v60, 0  ;;  %v3517_v4 = vpack.i.bf16 %v854_v59, %v850_v62  ;;  %v920_v7 = vpack.c.bf16 %v854_v59, %v854_v59  ;;  %v3264_v11 = vpop.f32.mrf.mxu1 }
 0x2fd   : > { %3266 = vmatpush3.bf16.xpose.msra.mxu1 %v988_v0  ;;  %v976_v56 = vpack.c.bf16 %v4439_v50, %v4439_v50 }
 0x2fe   : > { %v3512_v1 = vpack.i.bf16 %v856_v63, %v852_v57  ;;  %v3507_v2 = vpack.i.bf16 %v856_v63, %v850_v62  ;;  %3271 = vmatprep.subr.bf16.mxu1 %v3991_v22  ;;  %v948_v3 = vpack.c.bf16 %v856_v63, %v856_v63 }
 0x2ff   : > { %v1500_v58 = vsel %vm1452_vm4, %v976_v56, 0 }
 0x300   : > { %3513 = vrot.lane.b32.xlu1 %v3512_v1, %s3994_s20  ;;  %3508 = vrot.lane.b32.xlu0 %v3507_v2, %s3993_s30  ;;  %v1034_v6 = vsel %vm983_vm3, %v948_v3, 0 }
 0x304   : > { %3523 = vrot.lane.b32.xlu1 %v3512_v1, %s3995_s21  ;;  %3518 = vrot.lane.b32.xlu0 %v3517_v4, %s3994_s20 }
 0x305   : > { %3268 = vmatmul.mubr.msk.bf16.vlgmr.msra.gmra.mxu1 %vm983_vm3, %v919_v5 }
 0x306   : > { %3272 = vmatpush3.bf16.xpose.msra.mxu1 %v1034_v6  ;;  %3273 = vmatprep.mubr.msk.bf16.mxu1 %vm3992_vm2, %v3991_v22 }
 0x307   : > { %3277 = vmatprep.subr.bf16.mxu1 %v3991_v22 }
 0x308   : > { %3528 = vrot.lane.b32.xlu0 %v3517_v4, %s3995_s21 }
 0x30d   : > { %3274 = vmatmul.mubr.msk.bf16.vlgmr.msra.gmra.mxu1 %vm983_vm3, %v920_v7 }
 0x30e   : > { %3279 = vmatprep.mubr.msk.bf16.mxu1 %vm3992_vm2, %v3991_v22 }
 0x36c   : > { %v930_v12 = vpop.permute.xlu0 %929 }
 0x36d   : > { %v949_v13 = vpack.c.bf16 %v930_v12, %v930_v12 }
 0x36e   : > { %v904_v14 = vpop.permute.xlu1 %903 }
 0x36f   : > { %v1080_v15 = vsel %vm983_vm3, %v949_v13, 0  ;;  %v922_v37 = vpack.c.bf16 %v904_v14, %v904_v14 }
 0x370   : > { %3278 = vmatpush3.bf16.xpose.msra.mxu1 %v1080_v15 }
 0x371   : > { %3283 = vmatprep.subr.bf16.mxu1 %v3991_v22 }
 0x372   : > { %v3514_v16 = vpop.permute.xlu1 %3513  ;;  %v3509_v17 = vpop.permute.xlu0 %3508 }
 0x373   : > { %v3515_v18 = vunpack.i.l.bf16 %v3514_v16  ;;  %v3511_v19 = vunpack.i.h.bf16 %v3509_v17  ;;  %v3510_v20 = vunpack.i.l.bf16 %v3509_v17  ;;  %v3516_v27 = vunpack.i.h.bf16 %v3514_v16 }
 0x375   : > { %v951_v23 = vpack.c.bf16 %v3515_v18, %v3515_v18  ;;  %v950_v24 = vpack.c.bf16 %v3511_v19, %v3511_v19  ;;  %v921_v25 = vpack.c.bf16 %v3510_v20, %v3510_v20  ;;  %v952_v34 = vpack.c.bf16 %v3516_v27, %v3516_v27 }
 0x376   : > { %v3524_v26 = vpop.permute.xlu1 %3523  ;;  %v3519_v28 = vpop.permute.xlu0 %3518 }
 0x377   : > { %3280 = vmatmul.mubr.msk.bf16.vlgmr.msra.gmra.mxu1 %vm983_vm3, %v921_v25  ;;  %v1126_v29 = vsel %vm983_vm3, %v950_v24, 0  ;;  %v1172_v30 = vsel %vm983_vm3, %v951_v23, 0  ;;  %v3525_v31 = vunpack.i.l.bf16 %v3524_v26  ;;  %v3520_v33 = vunpack.i.l.bf16 %v3519_v28 }
 0x378   : > { %3285 = vmatprep.mubr.msk.bf16.mxu1 %vm3992_vm2, %v3991_v22  ;;  %3284 = vmatpush3.bf16.xpose.msra.mxu1 %v1126_v29  ;;  %v3526_v39 = vunpack.i.h.bf16 %v3524_v26  ;;  %v1218_v41 = vsel %vm983_vm3, %v952_v34, 0  ;;  %v3521_v44 = vunpack.i.h.bf16 %v3519_v28 }
 0x379   : > { %3290 = vmatpush3.bf16.xpose.msra.mxu0 %v1172_v30  ;;  %3295 = vmatprep.subr.bf16.mxu1 %v3991_v22  ;;  %v953_v36 = vpack.c.bf16 %v3525_v31, %v3525_v31  ;;  %v923_v38 = vpack.c.bf16 %v3520_v33, %v3520_v33 }
 0x37a   : > { %3301 = vmatprep.subr.bf16.mxu0 %v3991_v22  ;;  %v3529_v40 = vpop.permute.xlu0 %3528  ;;  %v954_v46 = vpack.c.bf16 %v3526_v39, %v3526_v39  ;;  %v924_v48 = vpack.c.bf16 %v3521_v44, %v3521_v44 }
 0x37b   : > { %v1264_v43 = vsel %vm983_vm3, %v953_v36, 0  ;;  %v3530_v45 = vunpack.i.l.bf16 %v3529_v40  ;;  %v3531_v55 = vunpack.i.h.bf16 %v3529_v40 }
 0x37c   : > { %v1310_v52 = vsel %vm983_vm3, %v954_v46, 0 }
 0x37d   : > { %v925_v51 = vpack.c.bf16 %v3530_v45, %v3530_v45  ;;  %v926_v57 = vpack.c.bf16 %v3531_v55, %v3531_v55 }
 0x37f   : > { %3286 = vmatmul.mubr.msk.bf16.vlgmr.msra.gmra.mxu1 %vm983_vm3, %v922_v37 }
 0x380   : > { %3292 = vmatmul.mubr.msk.bf16.vlgmr.msra.gmra.mxu0 %vm983_vm3, %v923_v38  ;;  %3296 = vmatpush3.bf16.xpose.msra.mxu1 %v1218_v41 }
 0x381   : > { %3302 = vmatpush3.bf16.xpose.msra.mxu0 %v1264_v43  ;;  %3297 = vmatprep.mubr.msk.bf16.mxu1 %vm3992_vm2, %v3991_v22 }
 0x382   : > { %3303 = vmatprep.mubr.msk.bf16.mxu0 %vm3992_vm2, %v3991_v22  ;;  %3307 = vmatprep.subr.bf16.mxu1 %v3991_v22 }
 0x383   : > { %3313 = vmatprep.subr.bf16.mxu0 %v3991_v22 }
 0x387   : > { %3298 = vmatmul.mubr.msk.bf16.vlgmr.msra.gmra.mxu1 %vm983_vm3, %v924_v48 }
 0x388   : > { %3304 = vmatmul.mubr.msk.bf16.vlgmr.msra.gmra.mxu0 %vm983_vm3, %v925_v51  ;;  %3308 = vmatpush3.bf16.xpose.msra.mxu1 %v1310_v52 }
 0x389   : > { %3309 = vmatprep.mubr.msk.bf16.mxu1 %vm3992_vm2, %v3991_v22  ;;  %3319 = vmatprep.subr.bf16.mxu1 %v3991_v22 }
 0x38a   : > { %3314 = vmatpush3.bf16.msra.mxu0 %v1454_v54  ;;  %3315 = vmatprep.mubr.msk.bf16.mxu0 %vm3992_vm2, %v3991_v22 }
 0x38b   : > { %3325 = vmatprep.subr.bf16.mxu0 %v3991_v22 }
 0x38f   : > { %3310 = vmatmul.mubr.msk.bf16.vlgmr.msra.gmra.mxu1 %vm983_vm3, %v926_v57 }
 0x390   : > { %3320 = vmatpush3.bf16.msra.mxu1 %v1500_v58  ;;  %3321 = vmatprep.mubr.msk.bf16.mxu1 %vm3992_vm2, %v3991_v22 }
 0x391   : > { %3331 = vmatprep.subr.bf16.mxu1 %v3991_v22 }
 0x3c5   : > { %v1024_v59 = vpop.f32.mrf.mxu1 }
 0x3c6   : > { %v1353_v60 = vsel %vm1352_vm5, %v1024_v59, -inf }
 0x3c7   : > { %1354 = vmax.xlane.f32.xlu1 %v1353_v60  ;;  %v3269_v61 = vpop.f32.mrf.mxu1 }
 0x3c9   : > { %v1027_v62 = vpop.f32.mrf.mxu1 }
 0x3cb   : > { %v3270_v63 = vpop.f32.mrf.mxu1 }
 0x3cd   : > { %v1070_v0 = vpop.f32.mrf.mxu1 }
 0x3ce   : > { %v1356_v1 = vsel %vm1352_vm5, %v1070_v0, -inf }
 0x3cf   : > { %1357 = vmax.xlane.f32.xlu0 %v1356_v1  ;;  %v3275_v2 = vpop.f32.mrf.mxu1 }
 0x3d1   : > { %v1073_v3 = vpop.f32.mrf.mxu1 }
 0x3d3   : > { %v3276_v4 = vpop.f32.mrf.mxu1 }
 0x437   : > { %v1116_v5 = vpop.f32.mrf.mxu1 }
 0x438   : > { %v1359_v6 = vsel %vm1352_vm5, %v1116_v5, -inf }
 0x439   : > { %1360 = vmax.xlane.f32.xlu0 %v1359_v6  ;;  %v3281_v7 = vpop.f32.mrf.mxu1 }
 0x43b   : > { %v1119_v8 = vpop.f32.mrf.mxu1 }
 0x43d   : > { %v3282_v9 = vpop.f32.mrf.mxu1 }
 0x43f   : > { %v1162_v10 = vpop.f32.mrf.mxu1 }
 0x440   : > { %v1208_v11 = vpop.f32.mrf.mxu0  ;;  %v1362_v12 = vsel %vm1352_vm5, %v1162_v10, -inf }
 0x441   : > { %v1365_v13 = vsel %vm1352_vm5, %v1208_v11, -inf  ;;  %1363 = vmax.xlane.f32.xlu1 %v1362_v12  ;;  %v3287_v14 = vpop.f32.mrf.mxu1 }
 0x442   : > { %v3293_v15 = vpop.f32.mrf.mxu0  ;;  %1366 = vmax.xlane.f32.xlu0 %v1365_v13 }
 0x443   : > { %v1165_v16 = vpop.f32.mrf.mxu1 }
 0x444   : > { %v1211_v17 = vpop.f32.mrf.mxu0 }
 0x445   : > { %v3288_v18 = vpop.f32.mrf.mxu1 }
 0x446   : > { %v3294_v19 = vpop.f32.mrf.mxu0 }
 0x447   : > { %v4463_v20 = vpop.f32.mrf.mxu1 }
 0x448   : > { %v1300_v23 = vpop.f32.mrf.mxu0  ;;  %v1368_v24 = vsel %vm1352_vm5, %v4463_v20, -inf }
 0x449   : > { %v1371_v25 = vsel %vm1352_vm5, %v1300_v23, -inf  ;;  %1369 = vmax.xlane.f32.xlu1 %v1368_v24  ;;  %v3299_v26 = vpop.f32.mrf.mxu1 }
 0x44a   : > { %v3305_v27 = vpop.f32.mrf.mxu0  ;;  %1372 = vmax.xlane.f32.xlu0 %v1371_v25 }
 0x44b   : > { %v1257_v28 = vpop.f32.mrf.mxu1 }
 0x44c   : > { %v1303_v29 = vpop.f32.mrf.mxu0 }
 0x44d   : > { %v3300_v30 = vpop.f32.mrf.mxu1 }
 0x44e   : > { %v3306_v31 = vpop.f32.mrf.mxu0 }
 0x44f   : > { %v4468_v34 = vpop.f32.mrf.mxu1 }
 0x450   : > { %v1355_v33 = vpop.xlane.xlu1 %1354  ;;  %v1374_v36 = vsel %vm1352_vm5, %v4468_v34, -inf }
 0x451   : > { %v1377_v35 = vsub.f32 %v1024_v59, %v1355_v33  ;;  %1375 = vmax.xlane.f32.xlu1 %v1374_v36  ;;  %v3311_v37 = vpop.f32.mrf.mxu1 }
 0x453   : > { %v1385_v38 = vmul.f32 1.442695, %v1377_v35  ;;  %v1349_v39 = vpop.f32.mrf.mxu1 }
 0x455   : > { %3682 = vpow2.f32 %v1385_v38  ;;  %v3312_v40 = vpop.f32.mrf.mxu1 }
 0x458   : > { %v1358_v41 = vpop.xlane.xlu0 %1357 }
 0x459   : > { %v1378_v43 = vsub.f32 %v1070_v0, %v1358_v41 }
 0x45b   : > { %v1387_v44 = vmul.f32 1.442695, %v1378_v43 }
 0x45d   : > { %3684 = vpow2.f32 %v1387_v44 }
 0x462   : > { %v3683_v45 = vpop.eup %3682 }
 0x463   : > { %v1401_v46 = vsel %vm1352_vm5, %v3683_v45, 0.0 }
 0x464   : > { %1402 = vadd.xlane.f32.xlu0 %v1401_v46 }
 0x46a   : > { %v3685_v47 = vpop.eup %3684 }
 0x46b   : > { %v1404_v48 = vsel %vm1352_vm5, %v3685_v47, 0.0 }
 0x46c   : > { %1405 = vadd.xlane.f32.xlu1 %v1404_v48 }
 0x4c2   : > { %v1361_v51 = vpop.xlane.xlu0 %1360 }
 0x4c3   : > { %v1379_v52 = vsub.f32 %v1116_v5, %v1361_v51 }
 0x4c5   : > { %v1389_v54 = vmul.f32 1.442695, %v1379_v52 }
 0x4c7   : > { %3686 = vpow2.f32 %v1389_v54 }
 0x4ca   : > { %v1364_v55 = vpop.xlane.xlu1 %1363 }
 0x4cb   : > { %v1367_v56 = vpop.xlane.xlu0 %1366  ;;  %v1380_v57 = vsub.f32 %v1162_v10, %v1364_v55  ;;  %v3537_v10 = vpack.i.bf16 %v4439_v50, %v4427_v42 }
 0x4cc   : > { %v1381_v58 = vsub.f32 %v1208_v11, %v1367_v56 }
 0x4cd   : > { %v1391_v59 = vmul.f32 1.442695, %v1380_v57 }
 0x4ce   : > { %v1393_v60 = vmul.f32 1.442695, %v1381_v58 }
 0x4cf   : > { %3688 = vpow2.f32 %v1391_v59 }
 0x4d0   : > { %3690 = vpow2.f32 %v1393_v60 }
 0x4d2   : > { %v1370_v8 = vpop.xlane.xlu1 %1369 }
 0x4d3   : > { %v1373_v62 = vpop.xlane.xlu0 %1372  ;;  %v1382_v14 = vsub.f32 %v4463_v20, %v1370_v8 }
 0x4d4   : > { %v4474_v61 = vpop.eup %3686  ;;  %v1383_v63 = vsub.f32 %v1300_v23, %v1373_v62 }
 0x4d5   : > { %v1407_v0 = vsel %vm1352_vm5, %v4474_v61, 0.0  ;;  %v1395_v17 = vmul.f32 1.442695, %v1382_v14 }
 0x4d6   : > { %1408 = vadd.xlane.f32.xlu0 %v1407_v0  ;;  %v1397_v1 = vmul.f32 1.442695, %v1383_v63 }
 0x4d8   : > { %3692 = vpow2.f32 %v1397_v1 }
 0x4da   : > { %v1376_v11 = vpop.xlane.xlu1 %1375 }
 0x4db   : > { %v1384_v18 = vsub.f32 %v4468_v34, %v1376_v11 }
 0x4dc   : > { %v3689_v2 = vpop.eup %3688 }
 0x4dd   : > { %v4478_v3 = vpop.eup %3690  ;;  %v1410_v4 = vsel %vm1352_vm5, %v3689_v2, 0.0  ;;  %v1399_v50 = vmul.f32 1.442695, %v1384_v18 }
 0x4de   : > { %v1413_v5 = vsel %vm1352_vm5, %v4478_v3, 0.0  ;;  %1411 = vadd.xlane.f32.xlu1 %v1410_v4 }
 0x4df   : > { %1414 = vadd.xlane.f32.xlu0 %v1413_v5 }
 0x4e5   : > { %v4483_v6 = vpop.eup %3692 }
 0x4e6   : > { %v1419_v7 = vsel %vm1352_vm5, %v4483_v6, 0.0 }
 0x4e7   : > { %1420 = vadd.xlane.f32.xlu0 %v1419_v7 }
 0x4ed   : > { %v1403_v9 = vpop.xlane.xlu0 %1402 }
 0x4ee   : > { %3694 = vrcp.f32 %v1403_v9 }
 0x4ef   : > { %3538 = vrot.lane.b32.xlu1 %v3537_v10, %s3994_s20 }
 0x4f5   : > { %v1406_v12 = vpop.xlane.xlu1 %1405 }
 0x4f6   : > { %3696 = vrcp.f32 %v1406_v12 }
 0x4f7   : > { %3698 = vpow2.f32 %v1395_v17 }
 0x4f8   : > { %3700 = vpow2.f32 %v1399_v50 }
 0x4fb   : > { %v3695_v13 = vpop.eup %3694 }
 0x4fc   : > { %v1433_v15 = vmul.f32 %v3695_v13, %v3683_v45 }
 0x4fd   : > { %3533 = vrot.lane.b32.xlu0 %v3537_v10, %s3993_s30 }
 0x4fe   : > { %v1441_v16 = vpack.c.bf16 %v1433_v15, %v1433_v15 }
 0x500   : > { %3316 = vmatmul.mubr.msk.bf16.vlgmr.msra.gmra.mxu0 %vm1352_vm5, %v1441_v16 }
 0x501   : > { %3327 = vmatprep.mubr.msk.bf16.mxu0 %vm3992_vm2, %v3991_v22 }
 0x503   : > { %v3697_v42 = vpop.eup %3696 }
 0x504   : > { %v1434_v19 = vmul.f32 %v3697_v42, %v3685_v47  ;;  %v4499_v20 = vpop.eup %3698 }
 0x505   : > { %v1416_v24 = vsel %vm1352_vm5, %v4499_v20, 0.0  ;;  %v4503_v25 = vpop.eup %3700 }
 0x506   : > { %v1442_v23 = vpack.c.bf16 %v1434_v19, %v1434_v19  ;;  %v1422_v26 = vsel %vm1352_vm5, %v4503_v25, 0.0  ;;  %v3594_v19 = vld [vmem:[%s4305_s19 + $0x38] sm:$0xff]  }
 0x508   : > { %3322 = vmatmul.mubr.msk.bf16.vlgmr.msra.gmra.mxu1 %vm1352_vm5, %v1442_v23  ;;  %v3595_v23 = vld [vmem:[%s4305_s19 + $0x30] sm:$0xff]  }
 0x509   : > { %3333 = vmatprep.mubr.msk.bf16.mxu1 %vm3992_vm2, %v3991_v22 }
 0x513   : > { %1417 = vadd.xlane.f32.xlu1 %v1416_v24 }
 0x517   : > { %1423 = vadd.xlane.f32.xlu1 %v1422_v26 }
 0x528   : > { %3543 = vrot.lane.b32.xlu1 %v3537_v10, %s3995_s21 }
 0x55f   : > { %v1409_v27 = vpop.xlane.xlu0 %1408 }
 0x560   : > { %3702 = vrcp.f32 %v1409_v27 }
 0x567   : > { %v1412_v28 = vpop.xlane.xlu1 %1411 }
 0x568   : > { %3704 = vrcp.f32 %v1412_v28  ;;  %v1415_v29 = vpop.xlane.xlu0 %1414 }
 0x569   : > { %3706 = vrcp.f32 %v1415_v29  ;;  %v3597_v29 = vld [vmem:[%s4305_s19 + $0x20] sm:$0xff]  }
 0x56b   : > { %v3539_v31 = vpop.permute.xlu1 %3538 }
 0x56c   : > { %v3541_v36 = vunpack.i.h.bf16 %v3539_v31  ;;  %v3540_v37 = vunpack.i.l.bf16 %v3539_v31 }
 0x56d   : > { %v3703_v33 = vpop.eup %3702 }
 0x56e   : > { %v1435_v43 = vmul.f32 %v3703_v33, %v4474_v61  ;;  %v980_v45 = vpack.c.bf16 %v3541_v36, %v3541_v36  ;;  %v979_v46 = vpack.c.bf16 %v3540_v37, %v3540_v37 }
 0x570   : > { %v1421_v30 = vpop.xlane.xlu0 %1420  ;;  %v1443_v51 = vpack.c.bf16 %v1435_v43, %v1435_v43  ;;  %v1638_v55 = vsel %vm1452_vm4, %v979_v46, 0  ;;  %v1684_v56 = vsel %vm1452_vm4, %v980_v45, 0 }
 0x571   : > { %3708 = vrcp.f32 %v1421_v30 }
 0x574   : > { %v3534_v34 = vpop.permute.xlu0 %3533 }
 0x575   : > { %v3705_v35 = vpop.eup %3704  ;;  %v3536_v38 = vunpack.i.h.bf16 %v3534_v34  ;;  %v3535_v39 = vunpack.i.l.bf16 %v3534_v34 }
 0x576   : > { %v1436_v44 = vmul.f32 %v3705_v35, %v3689_v2  ;;  %v3707_v54 = vpop.eup %3706  ;;  %v3598_v35 = vld [vmem:[%s4305_s19 + $0x18] sm:$0xff]  }
 0x577   : > { %v978_v40 = vpack.c.bf16 %v3536_v38, %v3536_v38  ;;  %v977_v41 = vpack.c.bf16 %v3535_v39, %v3535_v39  ;;  %v1437_v57 = vmul.f32 %v3707_v54, %v4478_v3 }
 0x578   : > { %v1444_v52 = vpack.c.bf16 %v1436_v44, %v1436_v44  ;;  %v3601_v44 = vld [vmem:[%s4305_s19] sm:$0xff]  }
 0x579   : > { %v1546_v47 = vsel %vm1452_vm4, %v977_v41, 0  ;;  %v1592_v48 = vsel %vm1452_vm4, %v978_v40, 0  ;;  %v1445_v58 = vpack.c.bf16 %v1437_v57, %v1437_v57  ;;  %v3599_v40 = vld [vmem:[%s4305_s19 + $0x10] sm:$0xff]   ;;  %v3600_v41 = vld [vmem:[%s4305_s19 + $0x8] sm:$0xff]  }
 0x57a   : > { %3326 = vmatpush3.bf16.msra.mxu0 %v1546_v47  ;;  %3332 = vmatpush3.bf16.msra.mxu1 %v1592_v48 }
 0x57b   : > { %3337 = vmatprep.subr.bf16.mxu0 %v3991_v22  ;;  %3343 = vmatprep.subr.bf16.mxu1 %v3991_v22 }
 0x57d   : > { %3328 = vmatmul.mubr.msk.bf16.vlgmr.msra.gmra.mxu0 %vm1352_vm5, %v1443_v51  ;;  %3334 = vmatmul.mubr.msk.bf16.vlgmr.msra.gmra.mxu1 %vm1352_vm5, %v1444_v52 }
 0x57e   : > { %3338 = vmatpush3.bf16.msra.mxu0 %v1638_v55  ;;  %3344 = vmatpush3.bf16.msra.mxu1 %v1684_v56  ;;  %v3709_v61 = vpop.eup %3708 }
 0x57f   : > { %3339 = vmatprep.mubr.msk.bf16.mxu0 %vm3992_vm2, %v3991_v22  ;;  %3349 = vmatprep.subr.bf16.mxu0 %v3991_v22  ;;  %v1439_v2 = vmul.f32 %v3709_v61, %v4483_v6 }
 0x580   : > { %3345 = vmatprep.mubr.msk.bf16.mxu1 %vm3992_vm2, %v3991_v22  ;;  %3355 = vmatprep.subr.bf16.mxu1 %v3991_v22 }
 0x581   : > { %v1447_v7 = vpack.c.bf16 %v1439_v2, %v1439_v2 }
 0x585   : > { %3340 = vmatmul.mubr.msk.bf16.vlgmr.msra.gmra.mxu0 %vm1352_vm5, %v1445_v58 }
 0x586   : > { %3351 = vmatprep.mubr.msk.bf16.mxu0 %vm3992_vm2, %v3991_v22 }
 0x59c   : > { %v1418_v59 = vpop.xlane.xlu1 %1417 }
 0x59d   : > { %3710 = vrcp.f32 %v1418_v59 }
 0x5a0   : > { %v1424_v60 = vpop.xlane.xlu1 %1423 }
 0x5a1   : > { %3712 = vrcp.f32 %v1424_v60 }
 0x5a4   : > { %v3544_v62 = vpop.permute.xlu1 %3543 }
 0x5a5   : > { %v3545_v63 = vunpack.i.l.bf16 %v3544_v62  ;;  %v3546_v0 = vunpack.i.h.bf16 %v3544_v62 }
 0x5a7   : > { %v981_v1 = vpack.c.bf16 %v3545_v63, %v3545_v63  ;;  %v982_v5 = vpack.c.bf16 %v3546_v0, %v3546_v0 }
 0x5a9   : > { %v1730_v3 = vsel %vm1452_vm4, %v981_v1, 0  ;;  %v1776_v6 = vsel %vm1452_vm4, %v982_v5, 0 }
 0x5aa   : > { %v3711_v4 = vpop.eup %3710  ;;  %3350 = vmatpush3.bf16.msra.mxu0 %v1730_v3 }
 0x5ab   : > { %v1438_v8 = vmul.f32 %v3711_v4, %v4499_v20  ;;  %3361 = vmatprep.subr.bf16.mxu0 %v3991_v22  ;;  %v3596_v20 = vld [vmem:[%s4305_s19 + $0x28] sm:$0xff]  }
 0x5ad   : > { %3352 = vmatmul.mubr.msk.bf16.vlgmr.msra.gmra.mxu0 %vm1352_vm5, %v1447_v7  ;;  %v1446_v9 = vpack.c.bf16 %v1438_v8, %v1438_v8 }
 0x5ae   : > { %v3713_v10 = vpop.eup %3712  ;;  %3377 = vmatprep.mubr.msk.bf16.mxu0 %vm3992_vm2, %v3991_v22  ;;  %3362 = vmatpush3.bf16.msra.mxu0 %v3594_v19 }
 0x5af   : > { %3346 = vmatmul.mubr.msk.bf16.vlgmr.msra.gmra.mxu1 %vm1352_vm5, %v1446_v9  ;;  %v1440_v11 = vmul.f32 %v3713_v10, %v4503_v25  ;;  %3363 = vmatprep.subr.bf16.mxu0 %v3991_v22 }
 0x5b0   : > { %3356 = vmatpush3.bf16.msra.mxu1 %v1776_v6  ;;  %3357 = vmatprep.mubr.msk.bf16.mxu1 %vm3992_vm2, %v3991_v22 }
 0x5b1   : > { %v1448_v12 = vpack.c.bf16 %v1440_v11, %v1440_v11 }
 0x5b2   : > { %3364 = vmatpush3.bf16.msra.mxu0 %v3595_v23  ;;  %v3723_v23 = vld [vmem:[#allocation2 + $0x8] sm:$0xff] }
 0x5b3   : > { %3365 = vmatprep.subr.bf16.mxu0 %v3991_v22 }
 0x5b6   : > { %3366 = vmatpush3.bf16.msra.mxu0 %v3596_v20 }
 0x5b7   : > { %3358 = vmatmul.mubr.msk.bf16.vlgmr.msra.gmra.mxu1 %vm1352_vm5, %v1448_v12  ;;  %3367 = vmatprep.subr.bf16.mxu0 %v3991_v22  ;;  %v1869_v12 = vsub.s32 2, %v4382_v49 }
 0x5b8   : > { %2238 = vmatprep.mubr.bf16.mxu1 %v3990_v21 }
 0x5ba   : > { %3368 = vmatpush3.bf16.msra.mxu0 %v3597_v29 }
 0x5bb   : > { %3369 = vmatprep.subr.bf16.mxu0 %v3991_v22 }
 0x5be   : > { %3370 = vmatpush3.bf16.msra.mxu0 %v3598_v35 }
 0x5bf   : > { %3371 = vmatprep.subr.bf16.mxu0 %v3991_v22 }
 0x5c0   : > { %v4541_v13 = vpop.f32.mrf.mxu0 }
 0x5c2   : > { %v3317_v14 = vpop.f32.mrf.mxu0  ;;  %3372 = vmatpush3.bf16.msra.mxu0 %v3599_v40  ;;  %v3616_v40 = vld [vmem:[%s4307_s2 + $0xa4] ss:$16 sps:$4 sm:$0xff]  }
 0x5c3   : > { %3373 = vmatprep.subr.bf16.mxu0 %v3991_v22  ;;  %v1870_v14 = vrot.slane %v4390_v53, %v1869_v12 }
 0x5c4   : > { %v1493_v15 = vpop.f32.mrf.mxu0 }
 0x5c6   : > { %v3318_v16 = vpop.f32.mrf.mxu0  ;;  %3374 = vmatpush3.bf16.msra.mxu0 %v3600_v41  ;;  %v3619_v41 = vld [vmem:[%s4307_s2 + $0xac] ss:$16 sps:$4 sm:$0xff]  }
 0x5c7   : > { %3375 = vmatprep.subr.bf16.mxu0 %v3991_v22 }
 0x5c8   : > { %v4543_v17 = vpop.f32.mrf.mxu1 }
 0x5ca   : > { %v3323_v18 = vpop.f32.mrf.mxu1  ;;  %3376 = vmatpush3.bf16.msra.mxu0 %v3601_v44  ;;  %v3617_v44 = vld [vmem:[%s4307_s2 + $0xa8] ss:$16 sps:$4 sm:$0xff]  }
 0x5cc   : > { %v1539_v42 = vpop.f32.mrf.mxu1 }
 0x5ce   : > { %v3324_v50 = vpop.f32.mrf.mxu1 }
 0x63d   : > { %v1582_v24 = vpop.f32.mrf.mxu0  ;;  %v1628_v25 = vpop.f32.mrf.mxu1 }
 0x63e   : > { %v3547_v26 = vpack.i.bf16 %v1628_v25, %v1582_v24  ;;  %v3604_v24 = vld [vmem:[%s4307_s2 + $0xe4] ss:$16 sps:$4 sm:$0xff]   ;;  %v3605_v25 = vld [vmem:[%s4307_s2 + $0xe8] ss:$16 sps:$4 sm:$0xff]  }
 0x63f   : > { %v3329_v27 = vpop.f32.mrf.mxu0  ;;  %v3335_v28 = vpop.f32.mrf.mxu1  ;;  %2206 = vmatprep.subr.bf16.mxu1 %v3604_v24 }
 0x640   : > { %3548 = vrot.lane.b32.xlu0 %v3547_v26, %s3995_s21  ;;  %v3607_v26 = vld [vmem:[%s4307_s2 + $0xec] ss:$16 sps:$4 sm:$0xff]  }
 0x641   : > { %v1585_v30 = vpop.f32.mrf.mxu0  ;;  %v1631_v31 = vpop.f32.mrf.mxu1  ;;  %2249 = vmatprep.subr.bf16.mxu0 %v3607_v26  ;;  %v3655_v26 = vld [vmem:[%s4313_s23 + $0xf0] sm:$0xff]  }
 0x643   : > { %v3330_v33 = vpop.f32.mrf.mxu0  ;;  %v3336_v34 = vpop.f32.mrf.mxu1 }
 0x645   : > { %v1674_v36 = vpop.f32.mrf.mxu0 }
 0x647   : > { %v3341_v37 = vpop.f32.mrf.mxu0 }
 0x648   : > { %v3613_v37 = vld [vmem:[%s4307_s2 + $0xcc] ss:$16 sps:$4 sm:$0xff]  }
 0x649   : > { %v1677_v38 = vpop.f32.mrf.mxu0 }
 0x64a   : > { %v3608_v38 = vld [vmem:[%s4307_s2 + $0xc0] ss:$16 sps:$4 sm:$0xff]  }
 0x64b   : > { %v3342_v39 = vpop.f32.mrf.mxu0 }
 0x64c   : > { %v3611_v39 = vld [vmem:[%s4307_s2 + $0xc8] ss:$16 sps:$4 sm:$0xff]  }
 0x66d   : > { %v1766_v43 = vpop.f32.mrf.mxu0 }
 0x66f   : > { %v1720_v45 = vpop.f32.mrf.mxu1  ;;  %v3353_v46 = vpop.f32.mrf.mxu0 }
 0x670   : > { %v3552_v47 = vpack.i.bf16 %v1720_v45, %v1674_v36  ;;  %v3610_v36 = vld [vmem:[%s4307_s2 + $0xc4] ss:$16 sps:$4 sm:$0xff]   ;;  %v3620_v45 = vld [vmem:[%s4307_s2 + $0x80] ss:$16 sps:$4 sm:$0xff]  }
 0x671   : > { %v3347_v48 = vpop.f32.mrf.mxu1  ;;  %v1769_v51 = vpop.f32.mrf.mxu0  ;;  %v3622_v46 = vld [vmem:[%s4307_s2 + $0x84] ss:$16 sps:$4 sm:$0xff]  }
 0x672   : > { %3553 = vrot.lane.b32.xlu1 %v3552_v47, %s3994_s20  ;;  %v3623_v47 = vld [vmem:[%s4307_s2 + $0x88] ss:$16 sps:$4 sm:$0xff]   ;;  %v3625_v48 = vld [vmem:[%s4307_s2 + $0x8c] ss:$16 sps:$4 sm:$0xff]   ;;  %v3628_v51 = vld [vmem:[%s4307_s2 + $0x64] ss:$16 sps:$4 sm:$0xff]  }
 0x673   : > { %v1723_v52 = vpop.f32.mrf.mxu1  ;;  %v3354_v54 = vpop.f32.mrf.mxu0 }
 0x674   : > { %v3631_v52 = vld [vmem:[%s4307_s2 + $0x6c] ss:$16 sps:$4 sm:$0xff]   ;;  %v3626_v54 = vld [vmem:[%s4307_s2 + $0x60] ss:$16 sps:$4 sm:$0xff]  }
 0x675   : > { %v3348_v55 = vpop.f32.mrf.mxu1 }
 0x676   : > { %v3629_v55 = vld [vmem:[%s4307_s2 + $0x68] ss:$16 sps:$4 sm:$0xff]  }
 0x677   : > { %v1812_v56 = vpop.f32.mrf.mxu1 }
 0x678   : > { %v3557_v57 = vpack.i.bf16 %v1812_v56, %v1766_v43  ;;  %v3614_v43 = vld [vmem:[%s4307_s2 + $0xa0] ss:$16 sps:$4 sm:$0xff]   ;;  %v3634_v56 = vld [vmem:[%s4307_s2 + $0x44] ss:$16 sps:$4 sm:$0xff]  }
 0x679   : > { %v3359_v58 = vpop.f32.mrf.mxu1 }
 0x67a   : > { %3558 = vrot.lane.b32.xlu0 %v3557_v57, %s3993_s30  ;;  %v3637_v57 = vld [vmem:[%s4307_s2 + $0x4c] ss:$16 sps:$4 sm:$0xff]   ;;  %v3632_v58 = vld [vmem:[%s4307_s2 + $0x40] ss:$16 sps:$4 sm:$0xff]  }
 0x67b   : > { %v1815_v59 = vpop.f32.mrf.mxu1 }
 0x67c   : > { %v3635_v59 = vld [vmem:[%s4307_s2 + $0x48] ss:$16 sps:$4 sm:$0xff]  }
 0x67d   : > { %v3360_v60 = vpop.f32.mrf.mxu1 }
 0x67e   : > { %v3640_v60 = vld [vmem:[%s4307_s2 + $0x24] ss:$16 sps:$4 sm:$0xff]  }
 0x6b2   : > { %v3549_v22 = vpop.permute.xlu0 %3548 }
 0x6b3   : > { %v3551_v62 = vunpack.i.h.bf16 %v3549_v22  ;;  %v3550_v63 = vunpack.i.l.bf16 %v3549_v22  ;;  %v3643_v22 = vld [vmem:[%s4307_s2 + $0x2c] ss:$16 sps:$4 sm:$0xff]  }
 0x6b5   : > { %v1843_v3 = vsel %vm983_vm3, %v4543_v17, %v3551_v62  ;;  %v1842_v4 = vsel %vm983_vm3, %v4541_v13, %v3550_v63  ;;  %v3722_v17 = vld [vmem:[#allocation2] sm:$0xff]  ;;  %v3641_v62 = vld [vmem:[%s4307_s2 + $0x28] ss:$16 sps:$4 sm:$0xff]  }
 0x6b6   : > { %v3646_v63 = vld [vmem:[%s4307_s2 + $0x4] ss:$16 sps:$4 sm:$0xff]  }
 0x6e4   : > { %v3554_v61 = vpop.permute.xlu1 %3553 }
 0x6e5   : > { %v3556_v0 = vunpack.i.h.bf16 %v3554_v61  ;;  %v3555_v1 = vunpack.i.l.bf16 %v3554_v61  ;;  %v3638_v61 = vld [vmem:[%s4307_s2 + $0x20] ss:$16 sps:$4 sm:$0xff]  }
 0x6e7   : > { %v1846_v8 = vsel %vm1844_vm6, %v1843_v3, %v3556_v0  ;;  %v1845_v9 = vsel %vm1844_vm6, %v1842_v4, %v3555_v1  ;;  %v3649_v0 = vld [vmem:[%s4307_s2 + $0xc] ss:$16 sps:$4 sm:$0xff]   ;;  %v3644_v1 = vld [vmem:[%s4307_s2] ss:$16 sps:$4 sm:$0xff]  }
 0x6e8   : > { %v3650_v3 = vld [vmem:[%s4313_s23 + $0x78] sm:$0xff]  }
 0x6e9   : > { %v3651_v4 = vld [vmem:[%s4313_s23 + $0xf8] sm:$0xff]  }
 0x6ec   : > { %v3559_v2 = vpop.permute.xlu0 %3558 }
 0x6ed   : > { %v3561_v5 = vunpack.i.h.bf16 %v3559_v2  ;;  %v3560_v7 = vunpack.i.l.bf16 %v3559_v2  ;;  %v3647_v2 = vld [vmem:[%s4307_s2 + $0x8] ss:$16 sps:$4 sm:$0xff]  }
 0x6ef   : > { %v1849_v10 = vsel %vm1847_vm7, %v1846_v8, %v3561_v5  ;;  %v1848_v6 = vsel %vm1847_vm7, %v1845_v9, %v3560_v7 }
 0x6f0   : > { %v1866_v11 = vpack.c.bf16 %v1849_v10, %v1848_v6 }
 0x6f2   : > { %3378 = vmatmul.mubr.bf16.vlgmr.msra.gmra.mxu0 %v1866_v11  ;;  %v1987_v11 = vsub.s32 3, %v4382_v49 }
 0x6f3   : > { %2281 = vmatprep.mubr.bf16.mxu0 %v3990_v21  ;;  %v3602_v21 = vld [vmem:[%s4307_s2 + $0xe0] ss:$16 sps:$4 sm:$0xff]   ;;  %2250 = vmatpush1.bf16.msra.mxu0 %v3605_v25  ;;  %s4739_s2 = sld [smem:[#allocation24_spill]] (!%p3116_p0) }
 0x6f4   : > { %2207 = vmatpush1.bf16.msra.mxu1 %v3602_v21  ;;  %2251 = vmatprep.subr.bf16.mxu0 %v3613_v37  ;;  %v3653_v21 = vld [vmem:[%s4313_s23 + $0xb8] sm:$0xff]   ;;  %v3654_v25 = vld [vmem:[%s4313_s23 + $0x70] sm:$0xff]  }
 0x6f5   : > { %2208 = vmatprep.subr.bf16.mxu1 %v3610_v36  ;;  %v3665_v36 = vld [vmem:[%s4313_s23 + $0xa0] sm:$0xff]   ;;  %v3666_v37 = vld [vmem:[%s4313_s23 + $0x58] sm:$0xff]  }
 0x6f7   : > { %2252 = vmatpush1.bf16.msra.mxu0 %v3611_v39  ;;  %v3668_v39 = vld [vmem:[%s4313_s23 + $0x18] sm:$0xff]  }
 0x6f8   : > { %2209 = vmatpush1.bf16.msra.mxu1 %v3608_v38  ;;  %2253 = vmatprep.subr.bf16.mxu0 %v3619_v41  ;;  %v3667_v38 = vld [vmem:[%s4313_s23 + $0xd8] sm:$0xff]   ;;  %v3670_v41 = vld [vmem:[%s4313_s23 + $0x50] sm:$0xff]  }
 0x6f9   : > { %2210 = vmatprep.subr.bf16.mxu1 %v3616_v40  ;;  %v3669_v40 = vld [vmem:[%s4313_s23 + $0x98] sm:$0xff]  }
 0x6fb   : > { %2254 = vmatpush1.bf16.msra.mxu0 %v3617_v44  ;;  %v3672_v44 = vld [vmem:[%s4313_s23 + $0x10] sm:$0xff]  }
 0x6fc   : > { %2211 = vmatpush1.bf16.msra.mxu1 %v3614_v43  ;;  %2255 = vmatprep.subr.bf16.mxu0 %v3625_v48  ;;  %v3671_v43 = vld [vmem:[%s4313_s23 + $0xd0] sm:$0xff]   ;;  %v3676_v48 = vld [vmem:[%s4313_s23 + $0x8] sm:$0xff]  }
 0x6fd   : > { %2212 = vmatprep.subr.bf16.mxu1 %v3622_v46  ;;  %v3674_v46 = vld [vmem:[%s4313_s23 + $0x48] sm:$0xff]  }
 0x6ff   : > { %2256 = vmatpush1.bf16.msra.mxu0 %v3623_v47  ;;  %v3675_v47 = vld [vmem:[%s4313_s23 + $0xc8] sm:$0xff]  }
 0x700   : > { %2213 = vmatpush1.bf16.msra.mxu1 %v3620_v45  ;;  %2257 = vmatprep.subr.bf16.mxu0 %v3631_v52  ;;  %v3673_v45 = vld [vmem:[%s4313_s23 + $0x90] sm:$0xff]   ;;  %v3678_v52 = vld [vmem:[%s4313_s23 + $0x40] sm:$0xff]  }
 0x701   : > { %2214 = vmatprep.subr.bf16.mxu1 %v3628_v51  ;;  %v3677_v51 = vld [vmem:[%s4313_s23 + $0x88] sm:$0xff]  }
 0x703   : > { %2258 = vmatpush1.bf16.msra.mxu0 %v3629_v55  ;;  %v3680_v55 = vld [vmem:[%s4313_s23] sm:$0xff]  }
 0x704   : > { %2215 = vmatpush1.bf16.msra.mxu1 %v3626_v54  ;;  %2259 = vmatprep.subr.bf16.mxu0 %v3637_v57  ;;  %v3679_v54 = vld [vmem:[%s4313_s23 + $0xc0] sm:$0xff]   ;;  %v2032_v57 = vsub.s32 0, %v4382_v49 }
 0x705   : > { %2216 = vmatprep.subr.bf16.mxu1 %v3634_v56  ;;  %v3681_v56 = vld [vmem:[%s4313_s23 + $0x80] sm:$0xff]  }
 0x707   : > { %2260 = vmatpush1.bf16.msra.mxu0 %v3635_v59 }
 0x708   : > { %2217 = vmatpush1.bf16.msra.mxu1 %v3632_v58  ;;  %2261 = vmatprep.subr.bf16.mxu0 %v3643_v22  ;;  %v639_v58 = vld [vmem:[%s4315_s22 + $0x18] sm:$0xff]  ;;  %v3724_v22 = vld [vmem:[%s4315_s22 + $0x8] sm:$0xff] }
 0x709   : > { %2218 = vmatprep.subr.bf16.mxu1 %v3640_v60 }
 0x70b   : > { %2262 = vmatpush1.bf16.msra.mxu0 %v3641_v62  ;;  %v2045_v62 = vrot.slane %v639_v58, %v2032_v57 }
 0x70c   : > { %2219 = vmatpush1.bf16.msra.mxu1 %v3638_v61  ;;  %2263 = vmatprep.subr.bf16.mxu0 %v3649_v0  ;;  %v2037_v61 = vrot.slane %v3724_v22, %v2032_v57 }
 0x70d   : > { %2220 = vmatprep.subr.bf16.mxu1 %v3646_v63  ;;  %v4658_v63 = vld [vmem:[%s4315_s22] sm:$0xff] }
 0x70e   : > { %v2033_v0 = vrot.slane %v4658_v63, %v2032_v57 }
 0x70f   : > { %2264 = vmatpush1.bf16.msra.mxu0 %v3647_v2 }
 0x710   : > { %2221 = vmatpush1.bf16.msra.mxu1 %v3644_v1  ;;  %3208 = vmatprep.subr.bf16.mxu0 %v3651_v4  ;;  %v2041_v1 = vrot.slane %v4419_v32, %v2032_v57 }
 0x711   : > { %3186 = vmatprep.subr.bf16.mxu1 %v3650_v3 }
 0x7b2   : > { %v1953_v15 = vpop.f32.mrf.mxu0 }
 0x7b3   : > { %v1954_v13 = vadd.f32 %v1953_v15, %v1870_v14  ;;  %v1988_v15 = vrot.slane %v4390_v53, %v1987_v11 }
 0x7b4   : > { %v3379_v16 = vpop.f32.mrf.mxu0 }
 0x7b5   : > { %v1960_v18 = vadd.f32 %v3722_v17, %v1954_v13  ;;  %v1993_v13 = vsub.s32 4, %v4382_v49 }
 0x7b6   : > { %v1956_v42 = vpop.f32.mrf.mxu0 }
 0x7b7   : > { %v1957_v50 = vadd.f32 %v1956_v42, %v1870_v14  ;;  %1962 = vadd.xlane.f32.xlu1 %v1960_v18  ;;  %v1994_v42 = vrot.slane %v4390_v53, %v1993_v13  ;;  %v3656_v53 = vld [vmem:[%s4313_s23 + $0x30] sm:$0xff]  }
 0x7b8   : > { %v3380_v19 = vpop.f32.mrf.mxu0 }
 0x7b9   : > { %v1961_v20 = vadd.f32 %v3723_v23, %v1957_v50 }
 0x7bb   : > { %1964 = vadd.xlane.f32.xlu0 %v1961_v20 }
 0x840   : > { %v1963_v27 = vpop.xlane.xlu1 %1962 }
 0x841   : > { %v1967_v28 = vmul.f32 0.0078125, %v1963_v27  ;;  %v3657_v27 = vld [vmem:[%s4313_s23 + $0xb0] sm:$0xff]  }
 0x843   : > { %v4574_v29 = vsub.f32 %v1960_v18, %v1967_v28  ;;  %v3658_v28 = vld [vmem:[%s4313_s23 + $0x68] sm:$0xff]  }
 0x844   : > { %v1965_v30 = vpop.xlane.xlu0 %1964 }
 0x845   : > { %v1968_v31 = vmul.f32 0.0078125, %v1965_v30  ;;  %v1971_v33 = vmul.f32 %v4574_v29, %v4574_v29  ;;  %v3660_v30 = vld [vmem:[%s4313_s23 + $0x28] sm:$0xff]  }
 0x847   : > { %v4578_v34 = vsub.f32 %v1961_v20, %v1968_v31  ;;  %1973 = vadd.xlane.f32.xlu0 %v1971_v33  ;;  %v3652_v20 = vld [vmem:[%s4313_s23 + $0x38] sm:$0xff]   ;;  %v3661_v31 = vld [vmem:[%s4313_s23 + $0xa8] sm:$0xff]   ;;  %v3662_v33 = vld [vmem:[%s4313_s23 + $0x60] sm:$0xff]  }
 0x849   : > { %v1972_v35 = vmul.f32 %v4578_v34, %v4578_v34 }
 0x84b   : > { %1975 = vadd.xlane.f32.xlu1 %v1972_v35  ;;  %v3664_v35 = vld [vmem:[%s4313_s23 + $0x20] sm:$0xff]  }
 0x8d0   : > { %v1974_v5 = vpop.xlane.xlu0 %1973 }
 0x8d1   : > { %v1977_v7 = vmul.f32 0.0078125, %v1974_v5 }
 0x8d3   : > { %v1979_v8 = vadd.f32 1e-05, %v1977_v7 }
 0x8d4   : > { %v1976_v9 = vpop.xlane.xlu1 %1975 }
 0x8d5   : > { %3714 = vrsqrt.f32 %v1979_v8  ;;  %v1978_v10 = vmul.f32 0.0078125, %v1976_v9 }
 0x8d7   : > { %v1980_v6 = vadd.f32 1e-05, %v1978_v10 }
 0x8d9   : > { %3716 = vrsqrt.f32 %v1980_v6 }
 0x8e2   : > { %v3715_v12 = vpop.eup %3714 }
 0x8e3   : > { %v1983_v14 = vmul.f32 %v3715_v12, %v4574_v29  ;;  %v3659_v29 = vld [vmem:[%s4313_s23 + $0xe8] sm:$0xff]  }
 0x8e5   : > { %v1989_v18 = vmul.f32 %v1988_v15, %v1983_v14 }
 0x8e6   : > { %v3717_v16 = vpop.eup %3716 }
 0x8e7   : > { %v1984_v17 = vmul.f32 %v3717_v16, %v4578_v34  ;;  %v4618_v19 = vadd.f32 %v1994_v42, %v1989_v18  ;;  %v3663_v34 = vld [vmem:[%s4313_s23 + $0xe0] sm:$0xff]  }
 0x8e9   : > { %v1990_v50 = vmul.f32 %v1988_v15, %v1984_v17 }
 0x8eb   : > { %v4620_v23 = vadd.f32 %v1994_v42, %v1990_v50 }
 0x8ed   : > { %v2029_v24 = vpack.c.bf16 %v4620_v23, %v4618_v19 }
 0x8ef   : > { %2239 = vmatmul.mubr.bf16.vlgmr.msra.gmra.mxu1 %v2029_v24  ;;  %2282 = vmatmul.mubr.bf16.vlgmr.msra.gmra.mxu0 %v2029_v24 }
 0x8f0   : > { %3187 = vmatpush3.bf16.msra.mxu1 %v3652_v20  ;;  %3209 = vmatpush3.bf16.msra.mxu0 %v3653_v21 }
 0x8f1   : > { %3188 = vmatprep.subr.bf16.mxu1 %v3654_v25  ;;  %3210 = vmatprep.subr.bf16.mxu0 %v3655_v26 }
 0x8f4   : > { %3189 = vmatpush3.bf16.msra.mxu1 %v3656_v53  ;;  %3211 = vmatpush3.bf16.msra.mxu0 %v3657_v27  ;;  %v2370_v27 = vsub.s32 7, %v4382_v49 }
 0x8f5   : > { %3190 = vmatprep.subr.bf16.mxu1 %v3658_v28  ;;  %3212 = vmatprep.subr.bf16.mxu0 %v3659_v29 }
 0x8f8   : > { %3191 = vmatpush3.bf16.msra.mxu1 %v3660_v30  ;;  %3213 = vmatpush3.bf16.msra.mxu0 %v3661_v31  ;;  %v2371_v30 = vrot.slane %v4658_v63, %v2370_v27 }
 0x8f9   : > { %3192 = vmatprep.subr.bf16.mxu1 %v3662_v33  ;;  %3214 = vmatprep.subr.bf16.mxu0 %v3663_v34 }
 0x8fc   : > { %3193 = vmatpush3.bf16.msra.mxu1 %v3664_v35  ;;  %3215 = vmatpush3.bf16.msra.mxu0 %v3665_v36 }
 0x8fd   : > { %3194 = vmatprep.subr.bf16.mxu1 %v3666_v37  ;;  %3216 = vmatprep.subr.bf16.mxu0 %v3667_v38 }
 0x900   : > { %3195 = vmatpush3.bf16.msra.mxu1 %v3668_v39  ;;  %3217 = vmatpush3.bf16.msra.mxu0 %v3669_v40 }
 0x901   : > { %3196 = vmatprep.subr.bf16.mxu1 %v3670_v41  ;;  %3218 = vmatprep.subr.bf16.mxu0 %v3671_v43 }
 0x904   : > { %3197 = vmatpush3.bf16.msra.mxu1 %v3672_v44  ;;  %3219 = vmatpush3.bf16.msra.mxu0 %v3673_v45 }
 0x905   : > { %3198 = vmatprep.subr.bf16.mxu1 %v3674_v46  ;;  %3220 = vmatprep.subr.bf16.mxu0 %v3675_v47 }
 0x908   : > { %3199 = vmatpush3.bf16.msra.mxu1 %v3676_v48  ;;  %3221 = vmatpush3.bf16.msra.mxu0 %v3677_v51 }
 0x909   : > { %3200 = vmatprep.subr.bf16.mxu1 %v3678_v52  ;;  %3222 = vmatprep.subr.bf16.mxu0 %v3679_v54 }
 0x90c   : > { %3201 = vmatpush3.bf16.msra.mxu1 %v3680_v55  ;;  %3223 = vmatpush3.bf16.msra.mxu0 %v3681_v56 }
 0x9af   : > { %v2240_v59 = vpop.f32.mrf.mxu1  ;;  %v2283_v60 = vpop.f32.mrf.mxu0 }
 0x9b0   : > { %v2241_v6 = vadd.f32 %v2240_v59, %v2033_v0  ;;  %v2284_v11 = vadd.f32 %v2283_v60, %v2041_v1 }
 0x9b1   : > { %v2242_v2 = vpop.f32.mrf.mxu1  ;;  %v2285_v3 = vpop.f32.mrf.mxu0 }
 0x9b2   : > { %v2243_v7 = vadd.f32 %v2242_v2, %v2037_v61  ;;  %v2286_v8 = vadd.f32 %v2285_v3, %v2045_v62  ;;  %v2292_v20 = vmax.f32 %v2241_v6, 0.0  ;;  %v2294_v21 = vmax.f32 %v2284_v11, 0.0 }
 0x9b3   : > { %v2244_v4 = vpop.f32.mrf.mxu1  ;;  %v2287_v5 = vpop.f32.mrf.mxu0 }
 0x9b4   : > { %v2245_v9 = vadd.f32 %v2244_v4, %v2033_v0  ;;  %v2288_v10 = vadd.f32 %v2287_v5, %v2041_v1  ;;  %v2293_v18 = vmax.f32 %v2243_v7, 0.0  ;;  %v2295_v42 = vmax.f32 %v2286_v8, 0.0 }
 0x9b5   : > { %v2246_v12 = vpop.f32.mrf.mxu1  ;;  %v2289_v14 = vpop.f32.mrf.mxu0  ;;  %v2678_v1 = vsub.s32 6, %v4382_v49 }
 0x9b6   : > { %v2247_v15 = vadd.f32 %v2246_v12, %v2037_v61  ;;  %v2290_v13 = vadd.f32 %v2289_v14, %v2045_v62  ;;  %v2296_v16 = vmax.f32 %v2245_v9, 0.0  ;;  %v2298_v17 = vmax.f32 %v2288_v10, 0.0 }
 0x9b7   : > { %v2679_v4 = vrot.slane %v4658_v63, %v2678_v1 }
 0x9b8   : > { %v2297_v50 = vmax.f32 %v2247_v15, 0.0  ;;  %v2299_v32 = vmax.f32 %v2290_v13, 0.0  ;;  %v2364_v26 = vpack.c.bf16 %v2296_v16, %v2292_v20  ;;  %v2366_v53 = vpack.c.bf16 %v2298_v17, %v2294_v21 }
 0x9ba   : > { %v2365_v24 = vpack.c.bf16 %v2297_v50, %v2293_v18  ;;  %v2367_v25 = vpack.c.bf16 %v2299_v32, %v2295_v42 }
 0x9bc   : > { %2596 = vmatprep.mubr.bf16.mxu1 %v2365_v24  ;;  %2637 = vmatprep.mubr.bf16.mxu0 %v2367_v25 }
 0x9bd   : > { %2597 = vmatmul.mubr.bf16.vlgmr.msra.gmra.mxu1 %v2364_v26  ;;  %2638 = vmatmul.mubr.bf16.vlgmr.msra.gmra.mxu0 %v2366_v53 }
 0xa7d   : > { %v3202_v28 = vpop.f32.mrf.mxu1  ;;  %v3224_v29 = vpop.f32.mrf.mxu0 }
 0xa7f   : > { %v3203_v31 = vpop.f32.mrf.mxu1  ;;  %v3225_v33 = vpop.f32.mrf.mxu0 }
 0xa80   : > { %v3204_v34 = vadd.f32 %v3203_v31, %v3202_v28  ;;  %v3226_v38 = vadd.f32 %v3225_v33, %v3224_v29 }
 0xa81   : > { %v3205_v35 = vpop.f32.mrf.mxu1  ;;  %v3227_v36 = vpop.f32.mrf.mxu0 }
 0xa82   : > { %v2599_v37 = vadd.f32 %v3204_v34, %v2371_v30 }
 0xa83   : > { %v3206_v39 = vpop.f32.mrf.mxu1  ;;  %v3228_v40 = vpop.f32.mrf.mxu0 }
 0xa84   : > { %v2640_v41 = vadd.f32 %v3226_v38, %v2599_v37  ;;  %v3207_v43 = vadd.f32 %v3206_v39, %v3205_v35  ;;  %v3229_v45 = vadd.f32 %v3228_v40, %v3227_v36 }
 0xa86   : > { %v2602_v44 = vadd.f32 %v3207_v43, %v2371_v30  ;;  %v2646_v46 = vadd.f32 %v2640_v41, %v4618_v19 }
 0xa88   : > { %v2643_v47 = vadd.f32 %v3229_v45, %v2602_v44  ;;  %2648 = vadd.xlane.f32.xlu0 %v2646_v46 }
 0xa8a   : > { %v2647_v48 = vadd.f32 %v2643_v47, %v4620_v23  ;;  %v2672_v23 = vsub.s32 5, %v4382_v49 }
 0xa8c   : > { %2650 = vadd.xlane.f32.xlu1 %v2647_v48  ;;  %v2673_v2 = vrot.slane %v4658_v63, %v2672_v23 }
 0xb11   : > { %v2649_v51 = vpop.xlane.xlu0 %2648 }
 0xb12   : > { %v2652_v52 = vmul.f32 0.0078125, %v2649_v51 }
 0xb14   : > { %v2654_v54 = vsub.f32 %v2646_v46, %v2652_v52 }
 0xb15   : > { %v2651_v55 = vpop.xlane.xlu1 %2650 }
 0xb16   : > { %v2653_v56 = vmul.f32 0.0078125, %v2651_v55  ;;  %v2656_v57 = vmul.f32 %v2654_v54, %v2654_v54 }
 0xb18   : > { %v2655_v58 = vsub.f32 %v2647_v48, %v2653_v56  ;;  %2658 = vadd.xlane.f32.xlu0 %v2656_v57 }
 0xb1a   : > { %v2657_v59 = vmul.f32 %v2655_v58, %v2655_v58 }
 0xb1c   : > { %2660 = vadd.xlane.f32.xlu1 %v2657_v59 }
 0xba1   : > { %v2659_v60 = vpop.xlane.xlu0 %2658 }
 0xba2   : > { %v2662_v22 = vmul.f32 0.0078125, %v2659_v60 }
 0xba4   : > { %v2664_v61 = vadd.f32 1e-05, %v2662_v22 }
 0xba5   : > { %v2661_v62 = vpop.xlane.xlu1 %2660 }
 0xba6   : > { %3718 = vrsqrt.f32 %v2664_v61  ;;  %v2663_v19 = vmul.f32 0.0078125, %v2661_v62 }
 0xba8   : > { %v2665_v0 = vadd.f32 1e-05, %v2663_v19 }
 0xbaa   : > { %3720 = vrsqrt.f32 %v2665_v0 }
 0xbb3   : > { %v3719_v3 = vpop.eup %3718 }
 0xbb4   : > { %v2668_v5 = vmul.f32 %v3719_v3, %v2654_v54 }
 0xbb6   : > { %v2674_v7 = vmul.f32 %v2673_v2, %v2668_v5 }
 0xbb7   : > { %v3721_v8 = vpop.eup %3720 }
 0xbb8   : > { %v2680_v9 = vadd.f32 %v2679_v4, %v2674_v7  ;;  %v2669_v10 = vmul.f32 %v3721_v8, %v2655_v58 }
 0xbba   : > { %2682 = vst [vmem:[#allocation2] sm:$0xff] %v2680_v9  ;;  %v2675_v6 = vmul.f32 %v2673_v2, %v2669_v10  ;;  %2687 = sbr.rel (%p3116_p0) target bundleno = 3239 (0xca7), region = 88 }
 0xbbc   : > { %v2681_v11 = vadd.f32 %v2679_v4, %v2675_v6 }
 0xbbe   : > { %2683 = vst [vmem:[#allocation2 + $0x8] sm:$0xff] %v2681_v11 }
 0xbbf   : > { %v3726_v12 = vld [vmem:[#allocation3 + $0x38] sm:$0xff]   ;;  %v3996_v14 = vmov 0.0   ;;  %v3727_v49 = vld [vmem:[#allocation3 + $0x30] sm:$0xff]   ;;  %vm3997_vm8 = vmmov 0   ;;  %v2688_v63 = vrot.slane %v2680_v9, 4  ;;  %v2694_v15 = vrot.slane %v2681_v11, 4 }
 0xbc0   : > { %3381 = vmatprep.subr.bf16.mxu0 %v3996_v14  ;;  %3397 = vmatprep.mubr.msk.bf16.mxu0 %vm3997_vm8, %v3996_v14  ;;  %v3728_v17 = vld [vmem:[#allocation3 + $0x28] sm:$0xff]   ;;  %v3729_v20 = vld [vmem:[#allocation3 + $0x20] sm:$0xff]   ;;  %v3730_v53 = vld [vmem:[#allocation3 + $0x18] sm:$0xff]   ;;  %vm2730_vm9 = vcmask 1041409  }
 0xbc1   : > { %3382 = vmatpush3.bf16.msra.mxu0 %v3726_v12  ;;  %v2689_v13 = vadd.f32 %v2688_v63, %v2680_v9  ;;  %v2695_v16 = vadd.f32 %v2694_v15, %v2681_v11  ;;  %v3731_v29 = vld [vmem:[#allocation3 + $0x10] sm:$0xff]   ;;  %v3732_v33 = vld [vmem:[#allocation3 + $0x8] sm:$0xff]   ;;  %v3733_v36 = vld [vmem:[#allocation3] sm:$0xff]  }
 0xbc2   : > { %3383 = vmatprep.subr.bf16.mxu0 %v3996_v14  ;;  %v3117_v39 = vld [vmem:[%s4739_s2 + $0x8] ss:$0 sm:$0xff] }
 0xbc3   : > { %v2690_v18 = vrot.slane %v2689_v13, 2  ;;  %v2696_v42 = vrot.slane %v2695_v16, 2 }
 0xbc5   : > { %3384 = vmatpush3.bf16.msra.mxu0 %v3727_v49  ;;  %v2691_v50 = vadd.f32 %v2690_v18, %v2689_v13  ;;  %v2697_v32 = vadd.f32 %v2696_v42, %v2695_v16 }
 0xbc6   : > { %3385 = vmatprep.subr.bf16.mxu0 %v3996_v14 }
 0xbc7   : > { %v2692_v21 = vrot.slane %v2691_v50, 1  ;;  %v2698_v24 = vrot.slane %v2697_v32, 1 }
 0xbc9   : > { %3386 = vmatpush3.bf16.msra.mxu0 %v3728_v17  ;;  %v2693_v25 = vadd.f32 %v2692_v21, %v2691_v50  ;;  %v2699_v26 = vadd.f32 %v2698_v24, %v2697_v32 }
 0xbca   : > { %3387 = vmatprep.subr.bf16.mxu0 %v3996_v14 }
 0xbcb   : > { %v2701_v27 = vmul.f32 0.125, %v2693_v25  ;;  %v2702_v28 = vmul.f32 0.125, %v2699_v26 }
 0xbcd   : > { %3388 = vmatpush3.bf16.msra.mxu0 %v3729_v20  ;;  %v2720_v30 = vpack.c.bf16 %v2701_v27, %v2701_v27  ;;  %v2721_v31 = vpack.c.bf16 %v2702_v28, %v2702_v28 }
 0xbce   : > { %3389 = vmatprep.subr.bf16.mxu0 %v3996_v14 }
 0xbcf   : > { %v2728_v34 = vunpack.c.l.b16 %v2720_v30  ;;  %v2729_v35 = vunpack.c.l.b16 %v2721_v31 }
 0xbd1   : > { %3390 = vmatpush3.bf16.msra.mxu0 %v3730_v53  ;;  %v2731_v37 = vsel %vm2730_vm9, %v2729_v35, %v2728_v34 }
 0xbd2   : > { %3391 = vmatprep.subr.bf16.mxu0 %v3996_v14  ;;  %v2732_v38 = vpack.c.b16 %v2731_v37, %v2731_v37 }
 0xbd5   : > { %3392 = vmatpush3.bf16.msra.mxu0 %v3731_v29 }
 0xbd6   : > { %3393 = vmatprep.subr.bf16.mxu0 %v3996_v14 }
 0xbd9   : > { %3394 = vmatpush3.bf16.msra.mxu0 %v3732_v33 }
 0xbda   : > { %3395 = vmatprep.subr.bf16.mxu0 %v3996_v14 }
 0xbdd   : > { %3396 = vmatpush3.bf16.msra.mxu0 %v3733_v36 }
 0xbe0   : > { %3398 = vmatmul.mubr.bf16.vlgmr.msra.gmra.mxu0 %v2732_v38 }
 0xca0   : > { %v2816_v40 = vpop.f32.mrf.mxu0 }
 0xca1   : > { %v2817_v41 = vadd.f32 %v3117_v39, %v2816_v40 }
 0xca2   : > { %v3399_v43 = vpop.f32.mrf.mxu0 }
 0xca3   : > { %2822 = vst [vmem:[#allocation14] sm:$0x3] %v2817_v41 }
 0xca4   : > { %v2819_v44 = vpop.f32.mrf.mxu0 }
 0xca6   : > { %v3400_v45 = vpop.f32.mrf.mxu0 }
 0xca7 PF: > { %p3445_p6 = scmp.eq.s32.totalorder %s4180_s28, 2  ;;  %s3998_s9 = smov [#allocation14]  }
 0xca8   : > { %s2830_s23 = sshll.u32 %s3998_s9, 4  ;;  %s2831_s23 = int_to_ptr.vmem [resolvable:$true] %s2830_s23 }
 0xca9   : > { %s3900_s15 = scalar_lea.vmem %s2831_s23, 32  ;;  %p3907_p9 = scmp.lt.s32.totalorder %s2831_s23, %s2831_s23 }
 0xcaa   : > { %p3901_p4 = scmp.ne.s32.totalorder %s2831_s23, %s3900_s15  ;;  %p3908_p10 = scmp.lt.s32.totalorder %s3900_s15, %s3900_s15 }
 0xcac   : > { %p3902_p8 = pnand %p3901_p4, %p3445_p6  ;;  %p3909_p11 = por %p3908_p10, %p3907_p9 }
 0xcae   : > { %p3903_p2 = pneg %p3902_p8 }
 0xcb0   : > { %p3910_p12 = pnand %p3909_p11, %p3903_p2 }
 0xcb2   : > { %3913 = shalt.err (!%p3910_p12)
}
 0xcb3   : > { %s4740_s16 = sld [smem:[#allocation27_spill]] }
 0xcb9   : > { %3419 = dma.vmem_to_hbm [thread:$0]  (%p3445_p6), %s2831_s23, 32, %s4740_s16, [#allocation5]  }
 0xcba   : > { %3957 = dma.done.wait (%p3445_p6), [#allocation5], 32  }
 0xcbb   : > { %3959 = vsyncadd (%p3445_p6), [#allocation5], 4294967264 }
 0xcbc PF: > { %s4741_s12 = sld [smem:[#allocation21_spill]]  ;;  %s4744_s30 = smov %s3966_s10 }
 0xcbd   : > { %s4742_s4 = sld [smem:[#allocation20_spill]] }
 0xcbe   : > { %s4743_s11 = sld [smem:[#allocation22_spill]] }
 0xcc2   : > { %p27_p1 = scmp.ge.s32.totalorder %s4741_s12, 5  }
 0xcc3   : > { %s4745_s10 = smov %s4742_s4 }
 0xcc4   :  { %29 = sbr.rel (!%p27_p1) target bundleno = 15 (0xf), region = 154 }
 0xcc9   :  { %2843 = vsyncpa [#allocation4], 1 }
 0xcca   :  { %2845 = vsyncpa [#allocation4 + $0x1], 1 }
 0xccb   :  { %2846 = vsyncpa [#allocation7], 1 }
 0xccc   :  { %2848 = vsyncpa [#allocation7 + $0x1], 1 }
 0xccd   :  { %2849 = vsyncpa [#allocation10], 1 }
 0xcce   :  { %2851 = vsyncpa [#allocation10 + $0x1], 1 }
 0xccf   :  { %2852 = vsyncpa [#allocation13], 1 }
 0xcd0   :  { %2854 = vsyncpa [#allocation13 + $0x1], 1 }
 0xcd1   :  { %2855 = vsyncpa [#allocation5], 1 }
 0xcd2   :  { %2857 = vsyncpa [#allocation5 + $0x1], 1 }

</bundles_post_ra>
